<compile_context>
chip_gen: v7x
topology: tpu7x:2x2x1
jax: 0.10.0
libtpu: 0.0.40
codegen_flags: <defaults>
</compile_context>

<pallas_src>
import functools

import jax
import jax.numpy as jnp
from jax import lax
from jax.experimental import pallas as pl
from jax.experimental.pallas import tpu as pltpu

_LANES = 128
_ROW_TILE_CAP = 2048      # rows of 128 lanes per chunk -> 1 MiB per f32 input block.


def _round_up(x, m):
    return -(-x // m) * m


def _choose_row_tile(n_rows, cap):
    """Pick a sublane tile (rows of 128 lanes) and the padded row count."""
    num_chunks = max(1, -(-n_rows // cap))
    tile = _round_up(-(-n_rows // num_chunks), 16)   # multiple of 16 sublanes (f32 & bf16 safe)
    return tile, tile * num_chunks


def _mae_loss_kernel(src_lens_ref, mel_lens_ref, last_chunk_ref,   # scalar prefetch (SMEM, (B,))
                     mel_t_ref, mel_p_ref, post_p_ref,             # (row_tile, 128) chunks
                     pitch_p_ref, pitch_t_ref,                     # (1, T_src)
                     energy_p_ref, energy_t_ref,                   # (1, T_mel)
                     logdur_p_ref, attn_dur_ref,                   # (1, T_src)
                     out_ref,                                      # (8, 128) per-(b, chunk) partials
                     *, n_mels, row_tile):
    del last_chunk_ref                                  # consumed by the index_maps only
    b = pl.program_id(0)
    j = pl.program_id(1)

    lane = lax.broadcasted_iota(jnp.int32, (8, _LANES), 1)
    chunk_elems = row_tile * _LANES
    valid = mel_lens_ref[b] * n_mels            # valid flattened elements in this batch row
    thr = valid - j * chunk_elems               # remaining valid elements at this chunk's start

    # ---- initialize this step's output block; tiny per-row losses only at chunk 0 ----
    @pl.when(j == 0)
    def _small_losses():
        src_len = src_lens_ref[b]
        mel_len = mel_lens_ref[b]

        t_src = pitch_p_ref.shape[-1]
        src_m = lax.broadcasted_iota(jnp.int32, (1, t_src), 1) < src_len
        pitch_sum = jnp.sum(jnp.where(
            src_m,
            jnp.abs(pitch_p_ref[...].astype(jnp.float32)
                    - pitch_t_ref[...].astype(jnp.float32)),
            0.0))

        t_mel = energy_p_ref.shape[-1]
        mel_m = lax.broadcasted_iota(jnp.int32, (1, t_mel), 1) < mel_len
        energy_sum = jnp.sum(jnp.where(
            mel_m,
            jnp.abs(energy_p_ref[...].astype(jnp.float32)
                    - energy_t_ref[...].astype(jnp.float32)),
            0.0))

        # duration loss: plain (unmasked) L1 vs log(dur * src_mask + 1), like nn.L1Loss()
        dur_t = jnp.log(
            jnp.where(src_m, attn_dur_ref[...].astype(jnp.float32), 0.0) + 1.0)
        dur_sum = jnp.sum(jnp.abs(logdur_p_ref[...].astype(jnp.float32) - dur_t))

        out_ref[...] = (jnp.where(lane == 2, pitch_sum, 0.0)
                        + jnp.where(lane == 3, energy_sum, 0.0)
                        + jnp.where(lane == 4, dur_sum, 0.0))

    @pl.when(j != 0)
    def _zero_init():
        out_ref[...] = jnp.zeros_like(out_ref)

    # ---- heavy mel / postnet path: three scalar-gated fast paths ----
    @pl.when(thr >= chunk_elems)                # fully valid chunk: no mask math at all
    def _full_chunk():
        mel_t = mel_t_ref[...].astype(jnp.float32)
        s_mel = jnp.sum(jnp.abs(mel_p_ref[...].astype(jnp.float32) - mel_t))
        s_post = jnp.sum(jnp.abs(post_p_ref[...].astype(jnp.float32) - mel_t))
        out_ref[...] += (jnp.where(lane == 0, s_mel, 0.0)
                         + jnp.where(lane == 1, s_post, 0.0))

    @pl.when(jnp.logical_and(thr > 0, thr < chunk_elems))   # the single straddling chunk
    def _edge_chunk():
        mel_t = mel_t_ref[...].astype(jnp.float32)
        # j-offset already folded into the scalar thr -> one iota compare, no vector add of j
        pos = (lax.broadcasted_iota(jnp.int32, (row_tile, _LANES), 0) * _LANES
               + lax.broadcasted_iota(jnp.int32, (row_tile, _LANES), 1))
        keep = pos < thr
        s_mel = jnp.sum(jnp.where(
            keep, jnp.abs(mel_p_ref[...].astype(jnp.float32) - mel_t), 0.0))
        s_post = jnp.sum(jnp.where(
            keep, jnp.abs(post_p_ref[...].astype(jnp.float32) - mel_t), 0.0))
        out_ref[...] += (jnp.where(lane == 0, s_mel, 0.0)
                         + jnp.where(lane == 1, s_post, 0.0))
    # thr <= 0 (fully padded chunk): no compute; the clamped index_map also skips its DMA.


def mae_loss(mel_targets, mel_predictions, postnet_mel_predictions,
             pitch_predictions, pitch_targets,
             energy_predictions, energy_targets,
             log_duration_predictions, attn_hard_dur,
             src_lens, mel_lens, *, row_tile_cap=_ROW_TILE_CAP):
    """Returns (mel_loss, postnet_mel_loss, pitch_loss, energy_loss, duration_loss)."""
    B, T_mel, n_mels = mel_predictions.shape
    T_src = pitch_predictions.shape[1]

    src_lens = jnp.asarray(src_lens, jnp.int32)
    mel_lens = jnp.asarray(mel_lens, jnp.int32)

    # Mirror the module: mel_targets = mel_targets[:, :mel_masks.shape[1], :]
    mel_targets = mel_targets[:, :T_mel, :]

    # ---- lane-dense layout for the heavy mel path (layout plumbing only) ----
    flat_len = T_mel * n_mels
    n_rows = -(-flat_len // _LANES)
    row_tile, n_rows_pad = _choose_row_tile(n_rows, row_tile_cap)
    num_chunks = n_rows_pad // row_tile
    chunk_elems = row_tile * _LANES

    def _prep_mel(x):
        x = x.reshape(B, flat_len)
        pad = n_rows_pad * _LANES - flat_len
        if pad:
            x = jnp.pad(x, ((0, 0), (0, pad)))
        return x.reshape(B, n_rows_pad, _LANES)

    mel_t3 = _prep_mel(mel_targets)
    mel_p3 = _prep_mel(mel_predictions)
    post_p3 = _prep_mel(postnet_mel_predictions)

    pitch_p3 = pitch_predictions.reshape(B, 1, T_src)
    pitch_t3 = pitch_targets.reshape(B, 1, T_src)
    energy_p3 = energy_predictions.reshape(B, 1, T_mel)
    energy_t3 = energy_targets.reshape(B, 1, T_mel)
    logdur_p3 = log_duration_predictions.reshape(B, 1, T_src)
    attn_dur3 = attn_hard_dur.reshape(B, 1, T_src)

    # Last chunk that still holds valid data, per batch row (for the DMA-skipping index_map).
    last_chunk = jnp.maximum(
        (mel_lens * n_mels + chunk_elems - 1) // chunk_elems - 1, 0).astype(jnp.int32)

    def mel_map(bi, ji, sl, ml, lc):
        # Clamp the block index at the last valid chunk: consecutive fully-padded chunks map
        # to the same block, so the pipeline does not re-issue their HBM DMAs.
        return (bi, jnp.minimum(ji, lc[bi]), 0)

    mel_spec = pl.BlockSpec((None, row_tile, _LANES), mel_map)
    src_row_spec = pl.BlockSpec((None, 1, T_src), lambda bi, ji, sl, ml, lc: (bi, 0, 0))
    mel_row_spec = pl.BlockSpec((None, 1, T_mel), lambda bi, ji, sl, ml, lc: (bi, 0, 0))
    out_spec = pl.BlockSpec((None, None, 8, _LANES),
                            lambda bi, ji, sl, ml, lc: (bi, ji, 0, 0))

    grid_spec = pltpu.PrefetchScalarGridSpec(
        num_scalar_prefetch=3,
        grid=(B, num_chunks),
        in_specs=[mel_spec, mel_spec, mel_spec,
                  src_row_spec, src_row_spec,
                  mel_row_spec, mel_row_spec,
                  src_row_spec, src_row_spec],
        out_specs=out_spec,
    )

    partials = pl.pallas_call(
        functools.partial(_mae_loss_kernel, n_mels=n_mels, row_tile=row_tile),
        out_shape=jax.ShapeDtypeStruct((B, num_chunks, 8, _LANES), jnp.float32),
        grid_spec=grid_spec,
        compiler_params=pltpu.CompilerParams(
            dimension_semantics=("parallel", "parallel"),
            vmem_limit_bytes=32 * 1024 * 1024),
    )(src_lens, mel_lens, last_chunk, mel_t3, mel_p3, post_p3,
      pitch_p3, pitch_t3, energy_p3, energy_t3, logdur_p3, attn_dur3)

    # Tiny combine / normalization (5 scalars) in plain JAX.
    sums = jnp.sum(partials[:, :, 0, :], axis=(0, 1))
    frame_cnt = jnp.sum(mel_lens).astype(jnp.float32)        # # selected frames
    mel_cnt = frame_cnt * n_mels                              # # selected mel elements
    src_cnt = jnp.sum(src_lens).astype(jnp.float32)           # # selected phonemes
    # NOTE: matches PyTorch masked_select + mean -> NaN if a mask is entirely empty.
    mel_loss = sums[0] / mel_cnt
    postnet_mel_loss = sums[1] / mel_cnt
    pitch_loss = sums[2] / src_cnt
    energy_loss = sums[3] / frame_cnt
    duration_loss = sums[4] / float(B * T_src)
    return mel_loss, postnet_mel_loss, pitch_loss, energy_loss, duration_loss


def _reference(mel_t, mel_p, post_p, pitch_p, pitch_t, energy_p, energy_t,
               logdur_p, attn_dur, src_pad, mel_pad):
    """Pure-JAX reference for verification (mirrors the PyTorch module)."""
    src_m = (~src_pad).astype(jnp.float32)
    mel_m = (~mel_pad).astype(jnp.float32)
    mel_m3 = mel_m[:, :, None]
    n_mels = mel_t.shape[-1]
    mel_cnt = jnp.sum(mel_m) * n_mels
    mel_loss = jnp.sum(jnp.abs(mel_p - mel_t) * mel_m3) / mel_cnt
    post_loss = jnp.sum(jnp.abs(post_p - mel_t) * mel_m3) / mel_cnt
    pitch_loss = jnp.sum(jnp.abs(pitch_p - pitch_t) * src_m) / jnp.sum(src_m)
    energy_loss = jnp.sum(jnp.abs(energy_p - energy_t) * mel_m) / jnp.sum(mel_m)
    dur_t = jnp.log(attn_dur * src_m + 1.0)
    dur_loss = jnp.mean(jnp.abs(logdur_p - dur_t))
    return mel_loss, post_loss, pitch_loss, energy_loss, dur_loss


if __name__ == "__main__":
    key = jax.random.PRNGKey(0)
    B, T_src, T_mel, n_mels = 2, 8, 64, 32

    keys = jax.random.split(key, 10)
    mel_targets = jax.random.normal(keys[0], (B, T_mel, n_mels), jnp.float32)
    mel_predictions = jax.random.normal(keys[1], (B, T_mel, n_mels), jnp.float32)
    postnet_mel_predictions = jax.random.normal(keys[2], (B, T_mel, n_mels), jnp.float32)
    pitch_targets = jax.random.normal(keys[3], (B, T_src), jnp.float32)
    pitch_predictions = jax.random.normal(keys[4], (B, T_src), jnp.float32)
    energy_targets = jax.random.normal(keys[5], (B, T_mel), jnp.float32)
    energy_predictions = jax.random.normal(keys[6], (B, T_mel), jnp.float32)
    log_duration_predictions = jax.random.normal(keys[7], (B, T_src), jnp.float32)
    attn_hard_dur = jax.random.randint(keys[8], (B, T_src), 1, 5).astype(jnp.float32)

    src_lens = jnp.array([8, 6], dtype=jnp.int32)
    mel_lens = jnp.array([64, 48], dtype=jnp.int32)
    src_pad_mask = jnp.arange(T_src)[None, :] >= src_lens[:, None]   # True = padded
    mel_pad_mask = jnp.arange(T_mel)[None, :] >= mel_lens[:, None]

    ref = _reference(mel_targets, mel_predictions, postnet_mel_predictions,
                     pitch_predictions, pitch_targets,
                     energy_predictions, energy_targets,
                     log_duration_predictions, attn_hard_dur,
                     src_pad_mask, mel_pad_mask)

    # 1) default tile cap (single chunk per batch row at this size)
    losses = mae_loss(mel_targets, mel_predictions, postnet_mel_predictions,
                      pitch_predictions, pitch_targets,
                      energy_predictions, energy_targets,
                      log_duration_predictions, attn_hard_dur,
                      src_lens, mel_lens)
    losses = jax.block_until_ready(losses)
    for got, want in zip(losses, ref):
        assert jnp.allclose(got, want, rtol=1e-5, atol=1e-5), (got, want)

    # 2) tiny tile cap -> several chunks per row: exercises the full / straddling /
    #    fully-padded fast paths and the DMA-clamping index_map.
    losses_chunked = mae_loss(mel_targets, mel_predictions, postnet_mel_predictions,
                              pitch_predictions, pitch_targets,
                              energy_predictions, energy_targets,
                              log_duration_predictions, attn_hard_dur,
                              src_lens, mel_lens, row_tile_cap=4)
    losses_chunked = jax.block_until_ready(losses_chunked)
    for got, want in zip(losses_chunked, ref):
        assert jnp.allclose(got, want, rtol=1e-5, atol=1e-5), (got, want)

    # 3) Native-dtype streaming path: bf16 mel tensors in HBM, f32 accumulation in-kernel.
    losses_bf16 = mae_loss(mel_targets.astype(jnp.bfloat16),
                           mel_predictions.astype(jnp.bfloat16),
                           postnet_mel_predictions.astype(jnp.bfloat16),
                           pitch_predictions, pitch_targets,
                           energy_predictions, energy_targets,
                           log_duration_predictions, attn_hard_dur,
                           src_lens, mel_lens)
    losses_bf16 = jax.block_until_ready(losses_bf16)
    for got, want in zip(losses_bf16, ref):
        assert jnp.allclose(got, want, rtol=5e-2, atol=5e-2), (got, want)

    print("KERNEL_OK")
</pallas_src>

<mosaic_0001>
module attributes {stable_mosaic.version = 11 : i64} {
  func.func @_mae_loss_kernel(%arg0: i32, %arg1: i32, %arg2: memref<2xi32, #tpu.memory_space<smem>>, %arg3: memref<2xi32, #tpu.memory_space<smem>>, %arg4: memref<2xi32, #tpu.memory_space<smem>>, %arg5: memref<1x16x128xf32, #tpu.memory_space<vmem>>, %arg6: memref<1x16x128xf32, #tpu.memory_space<vmem>>, %arg7: memref<1x16x128xf32, #tpu.memory_space<vmem>>, %arg8: memref<1x1x8xf32, #tpu.memory_space<vmem>>, %arg9: memref<1x1x8xf32, #tpu.memory_space<vmem>>, %arg10: memref<1x1x64xf32, #tpu.memory_space<vmem>>, %arg11: memref<1x1x64xf32, #tpu.memory_space<vmem>>, %arg12: memref<1x1x8xf32, #tpu.memory_space<vmem>>, %arg13: memref<1x1x8xf32, #tpu.memory_space<vmem>>, %arg14: memref<1x1x8x128xf32, #tpu.memory_space<vmem>>) attributes {dimension_semantics = [#tpu.dimension_semantics<parallel>, #tpu.dimension_semantics<parallel>], iteration_bounds = array<i64: 2, 1>, scalar_prefetch = 3 : i64, scratch_operands = 0 : i64, tpu.core_type = #tpu.core_type<tc>, window_params = [{transform_indices = @transform_0, window_bounds = array<i64: 1, 16, 128>}, {transform_indices = @transform_1, window_bounds = array<i64: 1, 16, 128>}, {transform_indices = @transform_2, window_bounds = array<i64: 1, 16, 128>}, {transform_indices = @transform_3, window_bounds = array<i64: 1, 1, 8>}, {transform_indices = @transform_4, window_bounds = array<i64: 1, 1, 8>}, {transform_indices = @transform_5, window_bounds = array<i64: 1, 1, 64>}, {transform_indices = @transform_6, window_bounds = array<i64: 1, 1, 64>}, {transform_indices = @transform_7, window_bounds = array<i64: 1, 1, 8>}, {transform_indices = @transform_8, window_bounds = array<i64: 1, 1, 8>}, {transform_indices = @transform_9, window_bounds = array<i64: 1, 1, 8, 128>}]} {
    %0 = tpu.iota {dimensions = array<i32: 1>} : vector<8x128xi32>
    %1 = arith.index_cast %arg0 : i32 to index
    %2 = memref.load %arg3[%1] : memref<2xi32, #tpu.memory_space<smem>>
    %c32_i32 = arith.constant 32 : i32
    %3 = arith.muli %2, %c32_i32 : i32
    %c2048_i32 = arith.constant 2048 : i32
    %4 = arith.muli %arg1, %c2048_i32 : i32
    %5 = arith.subi %3, %4 : i32
    %c0_i32 = arith.constant 0 : i32
    %6 = arith.cmpi eq, %arg1, %c0_i32 : i32
    %7 = arith.extui %6 : i1 to i32
    %c0_i32_0 = arith.constant 0 : i32
    %8 = arith.cmpi ne, %7, %c0_i32_0 : i32
    scf.if %8 {
      %20 = arith.index_cast %arg0 : i32 to index
      %21 = memref.load %arg2[%20] : memref<2xi32, #tpu.memory_space<smem>>
      %22 = arith.index_cast %arg0 : i32 to index
      %23 = memref.load %arg3[%22] : memref<2xi32, #tpu.memory_space<smem>>
      %24 = tpu.iota {dimensions = array<i32: 1>} : vector<1x8xi32>
      %25 = vector.broadcast %21 : i32 to vector<1x8xi32>
      %26 = arith.cmpi slt, %24, %25 : vector<1x8xi32>
      %c0 = arith.constant 0 : index
      %c0_8 = arith.constant 0 : index
      %c0_9 = arith.constant 0 : index
      %27 = vector.load %arg8[%c0, %c0_8, %c0_9] : memref<1x1x8xf32, #tpu.memory_space<vmem>>, vector<1x1x8xf32>
      %28 = vector.shape_cast %27 : vector<1x1x8xf32> to vector<1x8xf32>
      %c0_10 = arith.constant 0 : index
      %c0_11 = arith.constant 0 : index
      %c0_12 = arith.constant 0 : index
      %29 = vector.load %arg9[%c0_10, %c0_11, %c0_12] : memref<1x1x8xf32, #tpu.memory_space<vmem>>, vector<1x1x8xf32>
      %30 = vector.shape_cast %29 : vector<1x1x8xf32> to vector<1x8xf32>
      %31 = arith.subf %28, %30 : vector<1x8xf32>
      %32 = math.absf %31 : vector<1x8xf32>
      %cst = arith.constant 0.000000e+00 : f32
      %33 = vector.broadcast %cst : f32 to vector<1x8xf32>
      %34 = arith.select %26, %32, %33 : vector<1x8xi1>, vector<1x8xf32>
      %35 = vector.shape_cast %34 : vector<1x8xf32> to vector<1x1x8xf32>
      %cst_13 = arith.constant dense<0.000000e+00> : vector<1xf32>
      %36 = vector.multi_reduction <add>, %35, %cst_13 [1, 2] : vector<1x1x8xf32> to vector<1xf32>
      %37 = vector.shape_cast %36 : vector<1xf32> to vector<1x1x1xf32>
      %38 = vector.extract %37[0, 0, 0] : f32 from vector<1x1x1xf32>
      %39 = tpu.iota {dimensions = array<i32: 1>} : vector<1x64xi32>
      %40 = vector.broadcast %23 : i32 to vector<1x64xi32>
      %41 = arith.cmpi slt, %39, %40 : vector<1x64xi32>
      %c0_14 = arith.constant 0 : index
      %c0_15 = arith.constant 0 : index
      %c0_16 = arith.constant 0 : index
      %42 = vector.load %arg10[%c0_14, %c0_15, %c0_16] : memref<1x1x64xf32, #tpu.memory_space<vmem>>, vector<1x1x64xf32>
      %43 = vector.shape_cast %42 : vector<1x1x64xf32> to vector<1x64xf32>
      %c0_17 = arith.constant 0 : index
      %c0_18 = arith.constant 0 : index
      %c0_19 = arith.constant 0 : index
      %44 = vector.load %arg11[%c0_17, %c0_18, %c0_19] : memref<1x1x64xf32, #tpu.memory_space<vmem>>, vector<1x1x64xf32>
      %45 = vector.shape_cast %44 : vector<1x1x64xf32> to vector<1x64xf32>
      %46 = arith.subf %43, %45 : vector<1x64xf32>
      %47 = math.absf %46 : vector<1x64xf32>
      %cst_20 = arith.constant 0.000000e+00 : f32
      %48 = vector.broadcast %cst_20 : f32 to vector<1x64xf32>
      %49 = arith.select %41, %47, %48 : vector<1x64xi1>, vector<1x64xf32>
      %50 = vector.shape_cast %49 : vector<1x64xf32> to vector<1x1x64xf32>
      %cst_21 = arith.constant dense<0.000000e+00> : vector<1xf32>
      %51 = vector.multi_reduction <add>, %50, %cst_21 [1, 2] : vector<1x1x64xf32> to vector<1xf32>
      %52 = vector.shape_cast %51 : vector<1xf32> to vector<1x1x1xf32>
      %53 = vector.extract %52[0, 0, 0] : f32 from vector<1x1x1xf32>
      %c0_22 = arith.constant 0 : index
      %c0_23 = arith.constant 0 : index
      %c0_24 = arith.constant 0 : index
      %54 = vector.load %arg13[%c0_22, %c0_23, %c0_24] : memref<1x1x8xf32, #tpu.memory_space<vmem>>, vector<1x1x8xf32>
      %55 = vector.shape_cast %54 : vector<1x1x8xf32> to vector<1x8xf32>
      %cst_25 = arith.constant 0.000000e+00 : f32
      %56 = vector.broadcast %cst_25 : f32 to vector<1x8xf32>
      %57 = arith.select %26, %55, %56 : vector<1x8xi1>, vector<1x8xf32>
      %cst_26 = arith.constant 1.000000e+00 : f32
      %58 = vector.broadcast %cst_26 : f32 to vector<1x8xf32>
      %59 = arith.addf %57, %58 : vector<1x8xf32>
      %60 = math.log %59 : vector<1x8xf32>
      %c0_27 = arith.constant 0 : index
      %c0_28 = arith.constant 0 : index
      %c0_29 = arith.constant 0 : index
      %61 = vector.load %arg12[%c0_27, %c0_28, %c0_29] : memref<1x1x8xf32, #tpu.memory_space<vmem>>, vector<1x1x8xf32>
      %62 = vector.shape_cast %61 : vector<1x1x8xf32> to vector<1x8xf32>
      %63 = arith.subf %62, %60 : vector<1x8xf32>
      %64 = math.absf %63 : vector<1x8xf32>
      %65 = vector.shape_cast %64 : vector<1x8xf32> to vector<1x1x8xf32>
      %cst_30 = arith.constant dense<0.000000e+00> : vector<1xf32>
      %66 = vector.multi_reduction <add>, %65, %cst_30 [1, 2] : vector<1x1x8xf32> to vector<1xf32>
      %67 = vector.shape_cast %66 : vector<1xf32> to vector<1x1x1xf32>
      %68 = vector.extract %67[0, 0, 0] : f32 from vector<1x1x1xf32>
      %c2_i32 = arith.constant 2 : i32
      %69 = vector.broadcast %c2_i32 : i32 to vector<8x128xi32>
      %70 = arith.cmpi eq, %0, %69 : vector<8x128xi32>
      %cst_31 = arith.constant 0.000000e+00 : f32
      %71 = vector.broadcast %38 : f32 to vector<8x128xf32>
      %72 = vector.broadcast %cst_31 : f32 to vector<8x128xf32>
      %73 = arith.select %70, %71, %72 : vector<8x128xi1>, vector<8x128xf32>
      %c3_i32 = arith.constant 3 : i32
      %74 = vector.broadcast %c3_i32 : i32 to vector<8x128xi32>
      %75 = arith.cmpi eq, %0, %74 : vector<8x128xi32>
      %cst_32 = arith.constant 0.000000e+00 : f32
      %76 = vector.broadcast %53 : f32 to vector<8x128xf32>
      %77 = vector.broadcast %cst_32 : f32 to vector<8x128xf32>
      %78 = arith.select %75, %76, %77 : vector<8x128xi1>, vector<8x128xf32>
      %79 = arith.addf %73, %78 : vector<8x128xf32>
      %c4_i32 = arith.constant 4 : i32
      %80 = vector.broadcast %c4_i32 : i32 to vector<8x128xi32>
      %81 = arith.cmpi eq, %0, %80 : vector<8x128xi32>
      %cst_33 = arith.constant 0.000000e+00 : f32
      %82 = vector.broadcast %68 : f32 to vector<8x128xf32>
      %83 = vector.broadcast %cst_33 : f32 to vector<8x128xf32>
      %84 = arith.select %81, %82, %83 : vector<8x128xi1>, vector<8x128xf32>
      %85 = arith.addf %79, %84 : vector<8x128xf32>
      %c0_34 = arith.constant 0 : index
      %c0_35 = arith.constant 0 : index
      %c0_36 = arith.constant 0 : index
      %c0_37 = arith.constant 0 : index
      %86 = vector.load %arg14[%c0_34, %c0_35, %c0_36, %c0_37] : memref<1x1x8x128xf32, #tpu.memory_space<vmem>>, vector<1x1x8x128xf32>
      %87 = vector.shape_cast %86 : vector<1x1x8x128xf32> to vector<8x128xf32>
      %88 = vector.shape_cast %85 : vector<8x128xf32> to vector<1x1x8x128xf32>
      tpu.vector_store %arg14[%c0_34, %c0_35, %c0_36, %c0_37], %88 {strides = array<i32>} : memref<1x1x8x128xf32, #tpu.memory_space<vmem>>, vector<1x1x8x128xf32>,
    } else {
    }
    %c0_i32_1 = arith.constant 0 : i32
    %9 = arith.cmpi ne, %arg1, %c0_i32_1 : i32
    %10 = arith.extui %9 : i1 to i32
    %c0_i32_2 = arith.constant 0 : i32
    %11 = arith.cmpi ne, %10, %c0_i32_2 : i32
    scf.if %11 {
      %cst = arith.constant 0.000000e+00 : f32
      %20 = vector.broadcast %cst : f32 to vector<8x128xf32>
      %c0 = arith.constant 0 : index
      %c0_8 = arith.constant 0 : index
      %c0_9 = arith.constant 0 : index
      %c0_10 = arith.constant 0 : index
      %21 = vector.load %arg14[%c0, %c0_8, %c0_9, %c0_10] : memref<1x1x8x128xf32, #tpu.memory_space<vmem>>, vector<1x1x8x128xf32>
      %22 = vector.shape_cast %21 : vector<1x1x8x128xf32> to vector<8x128xf32>
      %23 = vector.shape_cast %20 : vector<8x128xf32> to vector<1x1x8x128xf32>
      tpu.vector_store %arg14[%c0, %c0_8, %c0_9, %c0_10], %23 {strides = array<i32>} : memref<1x1x8x128xf32, #tpu.memory_space<vmem>>, vector<1x1x8x128xf32>,
    } else {
    }
    %c2048_i32_3 = arith.constant 2048 : i32
    %12 = arith.cmpi sge, %5, %c2048_i32_3 : i32
    %13 = arith.extui %12 : i1 to i32
    %c0_i32_4 = arith.constant 0 : i32
    %14 = arith.cmpi ne, %13, %c0_i32_4 : i32
    scf.if %14 {
      %c0 = arith.constant 0 : index
      %c0_8 = arith.constant 0 : index
      %c0_9 = arith.constant 0 : index
      %20 = vector.load %arg5[%c0, %c0_8, %c0_9] : memref<1x16x128xf32, #tpu.memory_space<vmem>>, vector<1x16x128xf32>
      %21 = vector.shape_cast %20 : vector<1x16x128xf32> to vector<16x128xf32>
      %c0_10 = arith.constant 0 : index
      %c0_11 = arith.constant 0 : index
      %c0_12 = arith.constant 0 : index
      %22 = vector.load %arg6[%c0_10, %c0_11, %c0_12] : memref<1x16x128xf32, #tpu.memory_space<vmem>>, vector<1x16x128xf32>
      %23 = vector.shape_cast %22 : vector<1x16x128xf32> to vector<16x128xf32>
      %24 = arith.subf %23, %21 : vector<16x128xf32>
      %25 = math.absf %24 : vector<16x128xf32>
      %26 = vector.shape_cast %25 : vector<16x128xf32> to vector<1x16x128xf32>
      %cst = arith.constant dense<0.000000e+00> : vector<1xf32>
      %27 = vector.multi_reduction <add>, %26, %cst [1, 2] : vector<1x16x128xf32> to vector<1xf32>
      %28 = vector.shape_cast %27 : vector<1xf32> to vector<1x1x1xf32>
      %29 = vector.extract %28[0, 0, 0] : f32 from vector<1x1x1xf32>
      %c0_13 = arith.constant 0 : index
      %c0_14 = arith.constant 0 : index
      %c0_15 = arith.constant 0 : index
      %30 = vector.load %arg7[%c0_13, %c0_14, %c0_15] : memref<1x16x128xf32, #tpu.memory_space<vmem>>, vector<1x16x128xf32>
      %31 = vector.shape_cast %30 : vector<1x16x128xf32> to vector<16x128xf32>
      %32 = arith.subf %31, %21 : vector<16x128xf32>
      %33 = math.absf %32 : vector<16x128xf32>
      %34 = vector.shape_cast %33 : vector<16x128xf32> to vector<1x16x128xf32>
      %cst_16 = arith.constant dense<0.000000e+00> : vector<1xf32>
      %35 = vector.multi_reduction <add>, %34, %cst_16 [1, 2] : vector<1x16x128xf32> to vector<1xf32>
      %36 = vector.shape_cast %35 : vector<1xf32> to vector<1x1x1xf32>
      %37 = vector.extract %36[0, 0, 0] : f32 from vector<1x1x1xf32>
      %c0_17 = arith.constant 0 : index
      %c0_18 = arith.constant 0 : index
      %c0_19 = arith.constant 0 : index
      %c0_20 = arith.constant 0 : index
      %38 = vector.load %arg14[%c0_17, %c0_18, %c0_19, %c0_20] : memref<1x1x8x128xf32, #tpu.memory_space<vmem>>, vector<1x1x8x128xf32>
      %39 = vector.shape_cast %38 : vector<1x1x8x128xf32> to vector<8x128xf32>
      %c0_i32_21 = arith.constant 0 : i32
      %40 = vector.broadcast %c0_i32_21 : i32 to vector<8x128xi32>
      %41 = arith.cmpi eq, %0, %40 : vector<8x128xi32>
      %cst_22 = arith.constant 0.000000e+00 : f32
      %42 = vector.broadcast %29 : f32 to vector<8x128xf32>
      %43 = vector.broadcast %cst_22 : f32 to vector<8x128xf32>
      %44 = arith.select %41, %42, %43 : vector<8x128xi1>, vector<8x128xf32>
      %c1_i32 = arith.constant 1 : i32
      %45 = vector.broadcast %c1_i32 : i32 to vector<8x128xi32>
      %46 = arith.cmpi eq, %0, %45 : vector<8x128xi32>
      %cst_23 = arith.constant 0.000000e+00 : f32
      %47 = vector.broadcast %37 : f32 to vector<8x128xf32>
      %48 = vector.broadcast %cst_23 : f32 to vector<8x128xf32>
      %49 = arith.select %46, %47, %48 : vector<8x128xi1>, vector<8x128xf32>
      %50 = arith.addf %44, %49 : vector<8x128xf32>
      %51 = arith.addf %39, %50 : vector<8x128xf32>
      %c0_24 = arith.constant 0 : index
      %c0_25 = arith.constant 0 : index
      %c0_26 = arith.constant 0 : index
      %c0_27 = arith.constant 0 : index
      %52 = vector.load %arg14[%c0_24, %c0_25, %c0_26, %c0_27] : memref<1x1x8x128xf32, #tpu.memory_space<vmem>>, vector<1x1x8x128xf32>
      %53 = vector.shape_cast %52 : vector<1x1x8x128xf32> to vector<8x128xf32>
      %54 = vector.shape_cast %51 : vector<8x128xf32> to vector<1x1x8x128xf32>
      tpu.vector_store %arg14[%c0_24, %c0_25, %c0_26, %c0_27], %54 {strides = array<i32>} : memref<1x1x8x128xf32, #tpu.memory_space<vmem>>, vector<1x1x8x128xf32>,
    } else {
    }
    %c0_i32_5 = arith.constant 0 : i32
    %15 = arith.cmpi sgt, %5, %c0_i32_5 : i32
    %c2048_i32_6 = arith.constant 2048 : i32
    %16 = arith.cmpi slt, %5, %c2048_i32_6 : i32
    %17 = arith.andi %15, %16 : i1
    %18 = arith.extui %17 : i1 to i32
    %c0_i32_7 = arith.constant 0 : i32
    %19 = arith.cmpi ne, %18, %c0_i32_7 : i32
    scf.if %19 {
      %c0 = arith.constant 0 : index
      %c0_8 = arith.constant 0 : index
      %c0_9 = arith.constant 0 : index
      %20 = vector.load %arg5[%c0, %c0_8, %c0_9] : memref<1x16x128xf32, #tpu.memory_space<vmem>>, vector<1x16x128xf32>
      %21 = vector.shape_cast %20 : vector<1x16x128xf32> to vector<16x128xf32>
      %22 = tpu.iota {dimensions = array<i32: 0>} : vector<16x128xi32>
      %c128_i32 = arith.constant 128 : i32
      %23 = vector.broadcast %c128_i32 : i32 to vector<16x128xi32>
      %24 = arith.muli %22, %23 : vector<16x128xi32>
      %25 = tpu.iota {dimensions = array<i32: 1>} : vector<16x128xi32>
      %26 = arith.addi %24, %25 : vector<16x128xi32>
      %27 = vector.broadcast %5 : i32 to vector<16x128xi32>
      %28 = arith.cmpi slt, %26, %27 : vector<16x128xi32>
      %c0_10 = arith.constant 0 : index
      %c0_11 = arith.constant 0 : index
      %c0_12 = arith.constant 0 : index
      %29 = vector.load %arg6[%c0_10, %c0_11, %c0_12] : memref<1x16x128xf32, #tpu.memory_space<vmem>>, vector<1x16x128xf32>
      %30 = vector.shape_cast %29 : vector<1x16x128xf32> to vector<16x128xf32>
      %31 = arith.subf %30, %21 : vector<16x128xf32>
      %32 = math.absf %31 : vector<16x128xf32>
      %cst = arith.constant 0.000000e+00 : f32
      %33 = vector.broadcast %cst : f32 to vector<16x128xf32>
      %34 = arith.select %28, %32, %33 : vector<16x128xi1>, vector<16x128xf32>
      %35 = vector.shape_cast %34 : vector<16x128xf32> to vector<1x16x128xf32>
      %cst_13 = arith.constant dense<0.000000e+00> : vector<1xf32>
      %36 = vector.multi_reduction <add>, %35, %cst_13 [1, 2] : vector<1x16x128xf32> to vector<1xf32>
      %37 = vector.shape_cast %36 : vector<1xf32> to vector<1x1x1xf32>
      %38 = vector.extract %37[0, 0, 0] : f32 from vector<1x1x1xf32>
      %c0_14 = arith.constant 0 : index
      %c0_15 = arith.constant 0 : index
      %c0_16 = arith.constant 0 : index
      %39 = vector.load %arg7[%c0_14, %c0_15, %c0_16] : memref<1x16x128xf32, #tpu.memory_space<vmem>>, vector<1x16x128xf32>
      %40 = vector.shape_cast %39 : vector<1x16x128xf32> to vector<16x128xf32>
      %41 = arith.subf %40, %21 : vector<16x128xf32>
      %42 = math.absf %41 : vector<16x128xf32>
      %cst_17 = arith.constant 0.000000e+00 : f32
      %43 = vector.broadcast %cst_17 : f32 to vector<16x128xf32>
      %44 = arith.select %28, %42, %43 : vector<16x128xi1>, vector<16x128xf32>
      %45 = vector.shape_cast %44 : vector<16x128xf32> to vector<1x16x128xf32>
      %cst_18 = arith.constant dense<0.000000e+00> : vector<1xf32>
      %46 = vector.multi_reduction <add>, %45, %cst_18 [1, 2] : vector<1x16x128xf32> to vector<1xf32>
      %47 = vector.shape_cast %46 : vector<1xf32> to vector<1x1x1xf32>
      %48 = vector.extract %47[0, 0, 0] : f32 from vector<1x1x1xf32>
      %c0_19 = arith.constant 0 : index
      %c0_20 = arith.constant 0 : index
      %c0_21 = arith.constant 0 : index
      %c0_22 = arith.constant 0 : index
      %49 = vector.load %arg14[%c0_19, %c0_20, %c0_21, %c0_22] : memref<1x1x8x128xf32, #tpu.memory_space<vmem>>, vector<1x1x8x128xf32>
      %50 = vector.shape_cast %49 : vector<1x1x8x128xf32> to vector<8x128xf32>
      %c0_i32_23 = arith.constant 0 : i32
      %51 = vector.broadcast %c0_i32_23 : i32 to vector<8x128xi32>
      %52 = arith.cmpi eq, %0, %51 : vector<8x128xi32>
      %cst_24 = arith.constant 0.000000e+00 : f32
      %53 = vector.broadcast %38 : f32 to vector<8x128xf32>
      %54 = vector.broadcast %cst_24 : f32 to vector<8x128xf32>
      %55 = arith.select %52, %53, %54 : vector<8x128xi1>, vector<8x128xf32>
      %c1_i32 = arith.constant 1 : i32
      %56 = vector.broadcast %c1_i32 : i32 to vector<8x128xi32>
      %57 = arith.cmpi eq, %0, %56 : vector<8x128xi32>
      %cst_25 = arith.constant 0.000000e+00 : f32
      %58 = vector.broadcast %48 : f32 to vector<8x128xf32>
      %59 = vector.broadcast %cst_25 : f32 to vector<8x128xf32>
      %60 = arith.select %57, %58, %59 : vector<8x128xi1>, vector<8x128xf32>
      %61 = arith.addf %55, %60 : vector<8x128xf32>
      %62 = arith.addf %50, %61 : vector<8x128xf32>
      %c0_26 = arith.constant 0 : index
      %c0_27 = arith.constant 0 : index
      %c0_28 = arith.constant 0 : index
      %c0_29 = arith.constant 0 : index
      %63 = vector.load %arg14[%c0_26, %c0_27, %c0_28, %c0_29] : memref<1x1x8x128xf32, #tpu.memory_space<vmem>>, vector<1x1x8x128xf32>
      %64 = vector.shape_cast %63 : vector<1x1x8x128xf32> to vector<8x128xf32>
      %65 = vector.shape_cast %62 : vector<8x128xf32> to vector<1x1x8x128xf32>
      tpu.vector_store %arg14[%c0_26, %c0_27, %c0_28, %c0_29], %65 {strides = array<i32>} : memref<1x1x8x128xf32, #tpu.memory_space<vmem>>, vector<1x1x8x128xf32>,
    } else {
    }
    return
  }
  func.func @transform_0(%arg0: i32, %arg1: i32, %arg2: memref<2xi32, #tpu.memory_space<smem>>, %arg3: memref<2xi32, #tpu.memory_space<smem>>, %arg4: memref<2xi32, #tpu.memory_space<smem>>) -> (i32, i32, i32) {
    %0 = arith.index_cast %arg0 : i32 to index
    %1 = memref.load %arg4[%0] : memref<2xi32, #tpu.memory_space<smem>>
    %2 = arith.minsi %arg1, %1 : i32
    %c0_i32 = arith.constant 0 : i32
    %c0_i32_0 = arith.constant 0 : i32
    return %arg0, %2, %c0_i32 : i32, i32, i32
  }
  func.func @transform_1(%arg0: i32, %arg1: i32, %arg2: memref<2xi32, #tpu.memory_space<smem>>, %arg3: memref<2xi32, #tpu.memory_space<smem>>, %arg4: memref<2xi32, #tpu.memory_space<smem>>) -> (i32, i32, i32) {
    %0 = arith.index_cast %arg0 : i32 to index
    %1 = memref.load %arg4[%0] : memref<2xi32, #tpu.memory_space<smem>>
    %2 = arith.minsi %arg1, %1 : i32
    %c0_i32 = arith.constant 0 : i32
    %c0_i32_0 = arith.constant 0 : i32
    return %arg0, %2, %c0_i32 : i32, i32, i32
  }
  func.func @transform_2(%arg0: i32, %arg1: i32, %arg2: memref<2xi32, #tpu.memory_space<smem>>, %arg3: memref<2xi32, #tpu.memory_space<smem>>, %arg4: memref<2xi32, #tpu.memory_space<smem>>) -> (i32, i32, i32) {
    %0 = arith.index_cast %arg0 : i32 to index
    %1 = memref.load %arg4[%0] : memref<2xi32, #tpu.memory_space<smem>>
    %2 = arith.minsi %arg1, %1 : i32
    %c0_i32 = arith.constant 0 : i32
    %c0_i32_0 = arith.constant 0 : i32
    return %arg0, %2, %c0_i32 : i32, i32, i32
  }
  func.func @transform_3(%arg0: i32, %arg1: i32, %arg2: memref<2xi32, #tpu.memory_space<smem>>, %arg3: memref<2xi32, #tpu.memory_space<smem>>, %arg4: memref<2xi32, #tpu.memory_space<smem>>) -> (i32, i32, i32) {
    %c0_i32 = arith.constant 0 : i32
    %c0_i32_0 = arith.constant 0 : i32
    %c0_i32_1 = arith.constant 0 : i32
    return %arg0, %c0_i32, %c0_i32_0 : i32, i32, i32
  }
  func.func @transform_4(%arg0: i32, %arg1: i32, %arg2: memref<2xi32, #tpu.memory_space<smem>>, %arg3: memref<2xi32, #tpu.memory_space<smem>>, %arg4: memref<2xi32, #tpu.memory_space<smem>>) -> (i32, i32, i32) {
    %c0_i32 = arith.constant 0 : i32
    %c0_i32_0 = arith.constant 0 : i32
    %c0_i32_1 = arith.constant 0 : i32
    return %arg0, %c0_i32, %c0_i32_0 : i32, i32, i32
  }
  func.func @transform_5(%arg0: i32, %arg1: i32, %arg2: memref<2xi32, #tpu.memory_space<smem>>, %arg3: memref<2xi32, #tpu.memory_space<smem>>, %arg4: memref<2xi32, #tpu.memory_space<smem>>) -> (i32, i32, i32) {
    %c0_i32 = arith.constant 0 : i32
    %c0_i32_0 = arith.constant 0 : i32
    %c0_i32_1 = arith.constant 0 : i32
    return %arg0, %c0_i32, %c0_i32_0 : i32, i32, i32
  }
  func.func @transform_6(%arg0: i32, %arg1: i32, %arg2: memref<2xi32, #tpu.memory_space<smem>>, %arg3: memref<2xi32, #tpu.memory_space<smem>>, %arg4: memref<2xi32, #tpu.memory_space<smem>>) -> (i32, i32, i32) {
    %c0_i32 = arith.constant 0 : i32
    %c0_i32_0 = arith.constant 0 : i32
    %c0_i32_1 = arith.constant 0 : i32
    return %arg0, %c0_i32, %c0_i32_0 : i32, i32, i32
  }
  func.func @transform_7(%arg0: i32, %arg1: i32, %arg2: memref<2xi32, #tpu.memory_space<smem>>, %arg3: memref<2xi32, #tpu.memory_space<smem>>, %arg4: memref<2xi32, #tpu.memory_space<smem>>) -> (i32, i32, i32) {
    %c0_i32 = arith.constant 0 : i32
    %c0_i32_0 = arith.constant 0 : i32
    %c0_i32_1 = arith.constant 0 : i32
    return %arg0, %c0_i32, %c0_i32_0 : i32, i32, i32
  }
  func.func @transform_8(%arg0: i32, %arg1: i32, %arg2: memref<2xi32, #tpu.memory_space<smem>>, %arg3: memref<2xi32, #tpu.memory_space<smem>>, %arg4: memref<2xi32, #tpu.memory_space<smem>>) -> (i32, i32, i32) {
    %c0_i32 = arith.constant 0 : i32
    %c0_i32_0 = arith.constant 0 : i32
    %c0_i32_1 = arith.constant 0 : i32
    return %arg0, %c0_i32, %c0_i32_0 : i32, i32, i32
  }
  func.func @transform_9(%arg0: i32, %arg1: i32, %arg2: memref<2xi32, #tpu.memory_space<smem>>, %arg3: memref<2xi32, #tpu.memory_space<smem>>, %arg4: memref<2xi32, #tpu.memory_space<smem>>) -> (i32, i32, i32, i32) {
    %c0_i32 = arith.constant 0 : i32
    %c0_i32_0 = arith.constant 0 : i32
    %c0_i32_1 = arith.constant 0 : i32
    return %arg0, %arg1, %c0_i32, %c0_i32_0 : i32, i32, i32, i32
  }
}

</mosaic_0001>

<bundles_post_ra>
// kernel: tpu_custom_call.1
= control target key start
LH: loop header
LB: loop body
LE: loop exit
PB: predicated region body
PF: predicated region fallthrough
CT: control target
= control target key end

     0   :  { %s2155_s0 = inlined_call_operand.hbm [shape: s32[2], index: 0, kind: input, shape index: {}]   ;;  %s2156_s3 = inlined_call_operand.hbm [shape: f32[2,16,128], index: 3, kind: input, shape index: {}]   ;;  %s2157_s4 = inlined_call_operand.hbm [shape: f32[2,16,128], index: 4, kind: input, shape index: {}]   ;;  %s2158_s5 = inlined_call_operand.hbm [shape: f32[2,16,128], index: 5, kind: input, shape index: {}]   ;;  %s2159_s6 = inlined_call_operand.vmem [shape: f32[2,1,8], index: 6, kind: input, shape index: {}]   ;;  %s2160_s7 = inlined_call_operand.vmem [shape: f32[2,1,8], index: 7, kind: input, shape index: {}]   ;;  %s2161_s8 = inlined_call_operand.vmem [shape: f32[2,1,64], index: 8, kind: input, shape index: {}]   ;;  %s2162_s9 = inlined_call_operand.vmem [shape: f32[2,1,64], index: 9, kind: input, shape index: {}]   ;;  %s2163_s10 = inlined_call_operand.vmem [shape: f32[2,1,8], index: 10, kind: input, shape index: {}]   ;;  %s2164_s11 = inlined_call_operand.vmem [shape: f32[2,1,8], index: 11, kind: input, shape index: {}]   ;;  %s2165_s12 = inlined_call_operand.hbm [shape: f32[2,1,8,128], index: 12, kind: output, shape index: {}]   ;;  %s2166_s1 = inlined_call_operand.vmem [shape: s32[2], index: 1, kind: input, shape index: {}]   ;;  %s2167_s2 = inlined_call_operand.hbm [shape: s32[2], index: 2, kind: input, shape index: {}]  }
   0x1   :  { %2197 = sst [smem:[#allocation39_spill]] %s2156_s3  ;;  %s1198_s23 = scalar_lea.hbm %s2155_s0, 16 }
   0x2   :  { %2198 = sst [smem:[#allocation40_spill]] %s2157_s4  ;;  %p1199_p0 = scmp.ne.s32.totalorder %s2155_s0, %s1198_s23 }
   0x3   :  { %2199 = sst [smem:[#allocation41_spill]] %s2158_s5  ;;  %p1202_p1 = scmp.lt.u32.totalorder %s1198_s23, %s2155_s0 }
   0x4   :  { %2200 = sst [smem:[#allocation42_spill]] %s2159_s6 }
   0x5   :  { %2201 = sst [smem:[#allocation43_spill]] %s2160_s7  ;;  %p1204_p2 = pnand %p1202_p1, %p1199_p0 }
   0x6   :  { %2202 = sst [smem:[#allocation44_spill]] %s2161_s8 }
   0x7   :  { %2203 = sst [smem:[#allocation45_spill]] %s2162_s9 }
   0x8   :  { %2204 = sst [smem:[#allocation46_spill]] %s2163_s10 }
   0x9   :  { %2205 = sst [smem:[#allocation47_spill]] %s2164_s11 }
   0xa   :  { %2206 = sst [smem:[#allocation48_spill]] %s2165_s12 }
   0xb   :  { %1207 = shalt.err (!%p1204_p2)  }
   0xc   :  { %s1486_s28 = smov [#allocation3]   ;;  %s19_s15 = sshll.u32 %s2166_s1, 4  ;;  %s20_s15 = int_to_ptr.vmem [resolvable:$true] %s19_s15 }
   0xd   :  { %18 = dma.hbm_to_smem %s2155_s0, 16, %s1486_s28, [#allocation2] }
   0xe   :  { %s1208_s16 = scalar_lea.vmem %s20_s15, 16  ;;  %p1213_p4 = scmp.lt.s32.totalorder %s20_s15, %s20_s15 }
   0xf   :  { %p1209_p3 = scmp.ne.s32.totalorder %s20_s15, %s1208_s16  ;;  %p1214_p5 = scmp.lt.s32.totalorder %s1208_s16, %s1208_s16 }
  0x11   :  { %p1215_p6 = por %p1214_p5, %p1213_p4 }
  0x13   :  { %p1216_p7 = pnand %p1215_p6, %p1209_p3 }
  0x15   :  { %1219 = shalt.err (!%p1216_p7)  }
  0x16   :  { %s1487_s17 = smov [#allocation4]   ;;  %s1220_s20 = scalar_lea.hbm %s2167_s2, 16 }
  0x17   :  { %22 = dma.vmem_to_smem %s20_s15, 16, %s1487_s17, [#allocation2] }
  0x18   :  { %p1221_p8 = scmp.ne.s32.totalorder %s2167_s2, %s1220_s20  ;;  %p1224_p9 = scmp.lt.u32.totalorder %s1220_s20, %s2167_s2 }
  0x1a   :  { %p1226_p10 = pnand %p1224_p9, %p1221_p8 }
  0x1c   :  { %1229 = shalt.err (!%p1226_p10)  }
  0x1d   :  { %s1488_s23 = smov [#allocation5]  }
  0x1e   :  { %24 = dma.hbm_to_smem %s2167_s2, 16, %s1488_s23, [#allocation2] }
  0x1f   :  { %1408 = dma.done.wait [#allocation2], 48 }
  0x20   :  { %1409 = vsyncadd [#allocation2], 4294967248 }
  0x21   :  { %26 = sfence }
  0x22   :  { %27 = vsyncpa [#allocation7], 0 }
  0x23   :  { %29 = vsyncpa [#allocation7 + $0x1], 0 }
  0x24   :  { %30 = vsyncpa [#allocation10], 0 }
  0x25   :  { %32 = vsyncpa [#allocation10 + $0x1], 0 }
  0x26   :  { %33 = vsyncpa [#allocation8], 0 }
  0x27   :  { %35 = vsyncpa [#allocation8 + $0x1], 0  ;;  %s1587_s26 = smov 0   ;;  %s1589_s27 = smov 0  }
  0x28   :  { %s1591_s28 = smov 0   ;;  %s1593_s29 = smov 0  }
  0x29   :  { %s1595_s30 = smov 0   ;;  %s1597_s2 = smov 0  }
  0x2a   :  { %s1599_s13 = smov 0   ;;  %s1601_s14 = smov 0  }
  0x2b   :  { %s1603_s15 = smov 0   ;;  %s1605_s16 = smov 0  }
  0x2c   :  { %s1607_s17 = smov 0   ;;  %s1609_s18 = smov 0  }
  0x2d   :  { %s1611_s19 = smov 0   ;;  %s1613_s20 = smov 0  }
  0x2e   :  { %s1615_s21 = smov 0  }
  0x2f LB: > { %2207 = sst [smem:[#allocation24_spill]] %s1428_s26  ;;  %s1661_s0 = sadd.s32 4294967295, %s1484_s21   ;;  %s1484_s21 = sphi %s1615_s21, %s41_s21   ;;  %s1480_s20 = sphi %s1613_s20, %s2287_s20   ;;  %s1476_s19 = sphi %s1611_s19, %s2286_s19   ;;  %s1472_s18 = sphi %s1609_s18, %s2285_s18   ;;  %s1468_s17 = sphi %s1607_s17, %s2284_s17   ;;  %s1464_s16 = sphi %s1605_s16, %s2283_s16   ;;  %s1460_s15 = sphi %s1603_s15, %s2282_s15   ;;  %s1456_s14 = sphi %s1601_s14, %s2292_s14   ;;  %s1452_s13 = sphi %s1599_s13, %s2291_s13   ;;  %s1448_s2 = sphi %s1597_s2, %s2290_s2   ;;  %s1444_s30 = sphi %s1595_s30, %s2289_s30   ;;  %s1440_s29 = sphi %s1593_s29, %s2288_s29   ;;  %s1436_s28 = sphi %s1591_s28, %s2280_s28   ;;  %s1432_s27 = sphi %s1589_s27, %s2279_s27   ;;  %s1428_s26 = sphi %s1587_s26, %s2278_s26  }
  0x30   : > { %2208 = sst [smem:[#allocation25_spill]] %s1432_s27  ;;  %s53_s22 = sadd.s32 1, %s1480_s20 }
  0x31   : > { %2209 = sst [smem:[#allocation26_spill]] %s1436_s28  ;;  %s986_s1 = sadd.s32 4294967294, %s1484_s21  }
  0x32   : > { %2210 = sst [smem:[#allocation27_spill]] %s1460_s15  ;;  %p55_p11 = scmp.ge.s32.totalorder %s53_s22, 2 }
  0x33   : > { %2211 = sst [smem:[#allocation28_spill]] %s1468_s17  ;;  %p2178_p12 = scmp.eq.s32.totalorder %s1661_s0, 0 }
  0x34   : > { %2212 = sst [smem:[#allocation29_spill]] %s1472_s18  ;;  %s2294_s22 = smov (%p55_p11, %s53_s22), 0 }
  0x35   : > { %2213 = sst [smem:[#allocation30_spill]] %s1476_s19  ;;  %p2180_p13 = scmp.eq.s32.totalorder %s1484_s21, 0 }
  0x36   : > { %2214 = sst [smem:[#allocation31_spill]] %s1480_s20  ;;  %p115_p0 = scmp.ne.s32.totalorder %s1456_s14, %s1452_s13 }
  0x37   : > { %s91_s23 = sld [smem:[#allocation5 + %s1480_s20]]  ;;  %s1673_s24 = ssub.s32 %s1480_s20, %s2294_s22 }
  0x38   : > { %2215 = sst [smem:[#allocation32_spill]] %s2294_s22  ;;  %p109_p1 = scmp.ne.s32.totalorder %s1460_s15, %s1456_s14 }
  0x39   : > { %s94_s25 = sld [smem:[#allocation5 + %s2294_s22]]  ;;  %p1680_p2 = por %p115_p0, %p2178_p12 }
  0x3a   : > { %p318_p3 = scmp.eq.s32.totalorder %s1673_s24, 0  ;;  %s320_s10 = sadd.s32 1, %s1436_s28 }
  0x3b   : > { %s2216_s12 = scalar_select %p1680_p2, 1, 0 }
  0x3c   : > { %p330_p5 = scmp.ne.s32.totalorder %s1436_s28, %s1432_s27  ;;  %p331_p7 = scmp.eq.s32.totalorder %s1661_s0, 1 }
  0x3d   : > { %p989_p4 = scmp.gt.s32.totalorder %s91_s23, 0  ;;  %p336_p8 = scmp.ne.s32.totalorder %s1432_s27, %s1428_s26 }
  0x3e   : > { %s1689_s13 = scalar_select %p318_p3, %s1436_s28, %s320_s10  }
  0x3f   : > { %s2296_s23 = smov (%p989_p4, %s91_s23), 0  ;;  %p990_p6 = scmp.gt.s32.totalorder %s94_s25, 0 }
  0x40   : > { %2217 = sst [smem:[#allocation33_spill]] %s1689_s13  ;;  %p337_p9 = scmp.eq.s32.totalorder %s986_s1, 1 }
  0x41   : > { %s2298_s25 = smov (%p990_p6, %s94_s25), 0  ;;  %p1694_p10 = por %p331_p7, %p330_p5 }
  0x42   : > { %p1698_p11 = por %p337_p9, %p336_p8  ;;  %s98_s10 = ssub.s32 %s2296_s23, %s2298_s25 }
  0x43   : > { %s2218_s9 = scalar_select %p1694_p10, 1, 0 }
  0x44   : > { %s2220_s8 = scalar_select %p1698_p11, 1, 0 }
  0x45   : > { %2219 = sst [smem:[#allocation34_spill]] %s2218_s9  ;;  %s99_s13 = sor.u32 %s98_s10, %s1673_s24 }
  0x46   : > { %2221 = sst [smem:[#allocation35_spill]] %s2220_s8  ;;  %s102_s28 = sadd.s32 1, %s1460_s15 }
  0x47   : > { %p100_p3 = scmp.eq.s32.totalorder %s99_s13, 0  ;;  %p111_p4 = por %p109_p1, %p2180_p13 }
  0x48   : > { %p2179_p5 = scmp.lt.s32.totalorder %s1484_s21, 2  ;;  %s1712_s1 = sshll.u32 %s1480_s20, 1 }
  0x49   : > { %s1715_s26 = scalar_select %p100_p3, %s1460_s15, %s102_s28  }
  0x4a   : > { %s385_s9 = sand.u32 1, %s1460_s15   ;;  %p1720_p6 = pnand %p2179_p5, %p111_p4 }
  0x4b   : > { %2222 = sst [smem:[#allocation36_spill]] %s1715_s26  ;;  %s1000_s8 = sshll.u32 %s385_s9, 4 }
  0x4c   : > { %s1038_s25 = scalar_select %p111_p4, [#allocation5], [#allocation14] }
  0x4d   : > { %s1039_s13 = scalar_select %p111_p4, %s1480_s20, 0 }
  0x4e   : > { %s2300_s25 = smov (!%p2179_p5, %s1038_s25), [#allocation17]  ;;  %s383_s28 = sand.u32 1, %s1484_s21  }
  0x4f   : > { %s2302_s13 = smov (!%p2179_p5, %s1039_s13), 0  ;;  %s387_s9 = scalar_lea.vmem [#allocation9], %s1000_s8 }
  0x50   : > { %s388_s10 = sld [smem:[%s2300_s25 + %s2302_s13]]  ;;  %s399_s26 = sshll.u32 %s387_s9, 4  ;;  %s1742_s26 = int_to_ptr.vmem [resolvable:$true] %s399_s26 }
  0x51   : > { %p1010_p1 = scmp.ge.s32.totalorder %s1484_s21, 1  ;;  %p469_p7 = scmp.lt.s32.totalorder %s1484_s21, 3 }
  0x52   : > { %s1737_s27 = sld [smem:[#allocation5 + %s1480_s20]]  ;;  %p81_p3 = scmp.ne.s32.totalorder %s1468_s17, %s1464_s16 }
  0x53   : > { %p1732_p8 = pnand %p1010_p1, %p469_p7  ;;  %s1740_s11 = sld [smem:[#allocation5 + %s2294_s22]] }
  0x54   : > { %p1751_p1 = por %p2178_p12, %p81_p3  ;;  %s2226_s4 = sld [smem:[#allocation40_spill]] }
  0x55   : > { %s2224_s15 = scalar_select %p1732_p8, 1, 0 }
  0x56   : > { %p1001_p9 = scmp.gt.s32.totalorder %s388_s10, 0  ;;  %p1232_p0 = pneg %p1720_p6 }
  0x57   : > { %s2225_s9 = scalar_select %p1751_p1, 1, 0 }
  0x58   : > { %s2304_s10 = smov (%p1001_p9, %s388_s10), 0 }
  0x59   : > { %s1002_s25 = sshll.u32 %s2304_s10, 1  ;;  %s1761_s10 = scalar_lea.sflag [#allocation10], %s383_s28 }
  0x5a   : > { %s396_s8 = sadd.s32 %s1002_s25, %s1712_s1  ;;  %s1235_s6 = scalar_lea.hbm %s2226_s4, 512 }
  0x5b   : > { %s1004_s13 = sshll.u32 %s396_s8, 7 }
  0x5c   : > { %s1758_s19 = scalar_lea.hbm %s2226_s4, %s1004_s13 }
  0x5d   : > { %s1230_s16 = scalar_lea.hbm %s1758_s19, 256  ;;  %p1236_p5 = scmp.lt.u32.totalorder %s1758_s19, %s2226_s4 }
  0x5e   : > { %p1231_p9 = scmp.ne.s32.totalorder %s1758_s19, %s1230_s16  ;;  %p1237_p13 = scmp.lt.u32.totalorder %s1235_s6, %s1230_s16 }
  0x5f   : > { %p1239_p7 = scmp.lt.u32.totalorder %s1230_s16, %s1758_s19 }
  0x60   : > { %p1233_p3 = pnand %p1232_p0, %p1231_p9  ;;  %p1238_p4 = por %p1237_p13, %p1236_p5 }
  0x62   : > { %p1234_p12 = pneg %p1233_p3  ;;  %p1240_p11 = por %p1239_p7, %p1238_p4 }
  0x64   : > { %p1241_p10 = pnand %p1240_p11, %p1234_p12 }
  0x66   : > { %1244 = shalt.err (!%p1241_p10)
}
  0x67   : > { %s1245_s28 = scalar_lea.vmem %s1742_s26, 256  ;;  %s1489_s25 = smov [#allocation9]  }
  0x68   : > { %p1246_p9 = scmp.ne.s32.totalorder %s1742_s26, %s1245_s28  ;;  %s1250_s8 = sshll.u32 %s1489_s25, 4  ;;  %s1251_s8 = int_to_ptr.vmem [resolvable:$false] %s1250_s8 }
  0x69   : > { %s1252_s7 = scalar_lea.vmem %s1251_s8, 512  ;;  %p1253_p1 = scmp.lt.s32.totalorder %s1742_s26, %s1251_s8 }
  0x6a   : > { %p1248_p3 = pnand %p1246_p9, %p1232_p0  ;;  %p1254_p13 = scmp.lt.s32.totalorder %s1252_s7, %s1245_s28 }
  0x6c   : > { %p1249_p2 = pneg %p1248_p3  ;;  %p1255_p5 = por %p1254_p13, %p1253_p1 }
  0x6e   : > { %p1256_p4 = pnand %p1255_p5, %p1249_p2 }
  0x70   : > { %1259 = shalt.err (!%p1256_p4)
}
  0x71   : > { %s2184_s16 = smov 128   ;;  %s2186_s6 = smov 8  }
  0x72   : > { %1059 = dma.hbm_to_vmem [thread:$0]  (!%p1720_p6), %s1758_s19, 256, %s1742_s26, %s1761_s10, %s2184_s16, %s2184_s16, %s2186_s6  }
  0x73   : > { %p2227_p12 = scmp.gt.s32.totalorder %s1737_s27, 0  ;;  %p988_p2 = scmp.gt.s32.totalorder %s1740_s11, 0 }
  0x74   : > { %p2228_p10 = scmp.ne.s32.totalorder %s1472_s18, %s1468_s17  ;;  %p2229_p11 = scmp.eq.s32.totalorder %s1484_s21, 0 }
  0x75   : > { %s2306_s27 = smov (%p2227_p12, %s1737_s27), 0  ;;  %s2188_s23 = sand.u32 1, %s1472_s18  }
  0x76   : > { %p1801_p0 = por %p2229_p11, %p2228_p10  ;;  %s2308_s11 = smov (%p988_p2, %s1740_s11), 0 }
  0x77   : > { %p2231_p6 = scmp.lt.s32.totalorder %s1484_s21, 2  ;;  %s64_s19 = ssub.s32 %s2306_s27, %s2308_s11 }
  0x78   : > { %s68_s28 = sadd.s32 1, %s1472_s18  ;;  %s65_s25 = sor.u32 %s64_s19, %s1673_s24 }
  0x79   : > { %p1811_p1 = pnand %p2231_p6, %p1801_p0  ;;  %s995_s8 = sshll.u32 %s2188_s23, 4 }
  0x7a   : > { %p66_p7 = scmp.eq.s32.totalorder %s65_s25, 0  ;;  %p2234_p9 = pmov %p2231_p6 }
  0x7b   : > { %s1035_s7 = scalar_select %p1801_p0, [#allocation5], [#allocation13] }
  0x7c   : > { %s1822_s16 = scalar_select %p66_p7, %s1472_s18, %s68_s28  }
  0x7d   : > { %s1036_s6 = scalar_select %p1801_p0, %s1480_s20, 0 }
  0x7e   : > { %2233 = sst [smem:[#allocation37_spill]] %s1822_s16  ;;  %s2310_s7 = smov (!%p2234_p9, %s1035_s7), [#allocation16] }
  0x7f   : > { %p2235_p3 = pmov %p2231_p6  ;;  %s1832_s27 = sld [smem:[#allocation5 + %s1480_s20]] }
  0x80   : > { %s1835_s19 = sld [smem:[#allocation5 + %s2294_s22]]  ;;  %p149_p13 = scmp.ne.s32.totalorder %s1444_s30, %s1440_s29 }
  0x81   : > { %s2312_s6 = smov (!%p2235_p3, %s1036_s6), 0  ;;  %s361_s28 = scalar_lea.vmem [#allocation6], %s995_s8 }
  0x82   : > { %s362_s11 = sld [smem:[%s2310_s7 + %s2312_s6]]  ;;  %s373_s25 = sshll.u32 %s361_s28, 4  ;;  %s1847_s25 = int_to_ptr.vmem [resolvable:$true] %s373_s25 }
  0x83   : > { %p143_p4 = scmp.ne.s32.totalorder %s1448_s2, %s1444_s30  ;;  %p2236_p12 = scmp.eq.s32.totalorder %s1661_s0, 0 }
  0x84   : > { %p2239_p10 = pmov %p2229_p11  ;;  %s2241_s3 = sld [smem:[#allocation39_spill]] }
  0x85   : > { %p1843_p2 = por %p149_p13, %p2236_p12  ;;  %p2242_p7 = pmov %p2235_p3 }
  0x86   : > { %p1851_p11 = por %p143_p4, %p2239_p10  ;;  %s2244_s22 = sand.u32 1, %s1472_s18  }
  0x87   : > { %s2237_s13 = scalar_select %p1843_p2, 1, 0 }
  0x88   : > { %p996_p5 = scmp.gt.s32.totalorder %s362_s11, 0  ;;  %p1867_p9 = pnand %p2242_p7, %p1851_p11 }
  0x89   : > { %2238 = sst [smem:[#allocation38_spill]] %s2237_s13  ;;  %p1262_p13 = pneg %p1811_p1 }
  0x8a   : > { %s2314_s11 = smov (%p996_p5, %s362_s11), 0  ;;  %s1265_s28 = scalar_lea.hbm %s2241_s3, 512 }
  0x8b   : > { %s997_s6 = sshll.u32 %s2314_s11, 1 }
  0x8c   : > { %s370_s29 = sadd.s32 %s1712_s1, %s997_s6  ;;  %s1873_s6 = scalar_lea.sflag [#allocation7], %s2244_s22 }
  0x8d   : > { %s999_s8 = sshll.u32 %s370_s29, 7 }
  0x8e   : > { %s1861_s4 = scalar_lea.hbm %s2241_s3, %s999_s8 }
  0x8f   : > { %s2243_s11 = scalar_select %p1867_p9, 1, 0 }
  0x90   : > { %s1260_s29 = scalar_lea.hbm %s1861_s4, 256  ;;  %p1266_p12 = scmp.lt.u32.totalorder %s1861_s4, %s2241_s3 }
  0x91   : > { %p1261_p3 = scmp.ne.s32.totalorder %s1861_s4, %s1260_s29  ;;  %p1267_p10 = scmp.lt.u32.totalorder %s1265_s28, %s1260_s29 }
  0x92   : > { %p1269_p6 = scmp.lt.u32.totalorder %s1260_s29, %s1861_s4 }
  0x93   : > { %p1263_p5 = pnand %p1262_p13, %p1261_p3  ;;  %p1268_p7 = por %p1267_p10, %p1266_p12 }
  0x95   : > { %p1264_p4 = pneg %p1263_p5  ;;  %p1270_p0 = por %p1269_p6, %p1268_p7 }
  0x97   : > { %p1271_p2 = pnand %p1270_p0, %p1264_p4 }
  0x99   : > { %1274 = shalt.err (!%p1271_p2)
}
  0x9a   : > { %s1275_s22 = scalar_lea.vmem %s1847_s25, 256  ;;  %s1492_s23 = smov [#allocation6]  }
  0x9b   : > { %p1276_p3 = scmp.ne.s32.totalorder %s1847_s25, %s1275_s22  ;;  %s1280_s8 = sshll.u32 %s1492_s23, 4  ;;  %s1281_s8 = int_to_ptr.vmem [resolvable:$false] %s1280_s8 }
  0x9c   : > { %s1282_s16 = scalar_lea.vmem %s1281_s8, 512  ;;  %p1283_p9 = scmp.lt.s32.totalorder %s1847_s25, %s1281_s8 }
  0x9d   : > { %p1278_p5 = pnand %p1276_p3, %p1262_p13  ;;  %p1284_p12 = scmp.lt.s32.totalorder %s1282_s16, %s1275_s22 }
  0x9f   : > { %p1279_p8 = pneg %p1278_p5  ;;  %p1285_p10 = por %p1284_p12, %p1283_p9 }
  0xa1   : > { %p1286_p6 = pnand %p1285_p10, %p1279_p8 }
  0xa3   : > { %1289 = shalt.err (!%p1286_p6)
}
  0xa4   : > { %s2245_s13 = smov 8   ;;  %s2246_s29 = smov 128  }
  0xa5   : > { %1054 = dma.hbm_to_vmem [thread:$0]  (!%p1811_p1), %s1861_s4, 256, %s1847_s25, %s1873_s6, %s2246_s29, %s2246_s29, %s2245_s13  }
  0xa6   : > { %p2247_p8 = scmp.gt.s32.totalorder %s1832_s27, 0  ;;  %p2248_p2 = scmp.gt.s32.totalorder %s1835_s19, 0 }
  0xa7   : > { %s1041_s26 = scalar_select %p1851_p11, [#allocation5], [#allocation15] }
  0xa8   : > { %s2316_s27 = smov (%p2247_p8, %s1832_s27), 0  ;;  %s2318_s19 = smov (%p2248_p2, %s1835_s19), 0 }
  0xa9   : > { %s132_s28 = ssub.s32 %s2316_s27, %s2318_s19  ;;  %s136_s23 = sadd.s32 1, %s1448_s2 }
  0xaa   : > { %s133_s22 = sor.u32 %s132_s28, %s1673_s24  ;;  %s411_s8 = sand.u32 1, %s1448_s2  }
  0xab   : > { %p134_p0 = scmp.eq.s32.totalorder %s133_s22, 0  ;;  %p2249_p9 = scmp.lt.s32.totalorder %s1484_s21, 2 }
  0xac   : > { %s1042_s16 = scalar_select %p1851_p11, %s1480_s20, 0 }
  0xad   : > { %s1919_s3 = scalar_select %p134_p0, %s1448_s2, %s136_s23  }
  0xae   : > { %s2320_s26 = smov (!%p2249_p9, %s1041_s26), [#allocation18]  ;;  %p2250_p1 = pmov %p2249_p9 }
  0xaf   : > { %s1005_s25 = sshll.u32 %s411_s8, 4  ;;  %s2251_s5 = sld [smem:[#allocation41_spill]] }
  0xb0   : > { %s2322_s16 = smov (!%p2250_p1, %s1042_s16), 0  ;;  %s413_s6 = scalar_lea.vmem [#allocation11], %s1005_s25 }
  0xb1   : > { %s414_s4 = sld [smem:[%s2320_s26 + %s2322_s16]]  ;;  %s425_s27 = sshll.u32 %s413_s6, 4  ;;  %s1926_s27 = int_to_ptr.vmem [resolvable:$true] %s425_s27 }
  0xb2   : > { %p2252_p4 = scmp.ne.s32.totalorder %s2243_s11, 0 }
  0xb4   : > { %p1292_p7 = pneg %p2252_p4 }
  0xb5   : > { %s1295_s16 = scalar_lea.hbm %s2251_s5, 512 }
  0xb7   : > { %p1006_p13 = scmp.gt.s32.totalorder %s414_s4, 0 }
  0xb9   : > { %s2324_s4 = smov (%p1006_p13, %s414_s4), 0 }
  0xba   : > { %s1007_s24 = sshll.u32 %s2324_s4, 1 }
  0xbb   : > { %s422_s19 = sadd.s32 %s1007_s24, %s1712_s1 }
  0xbc   : > { %s1009_s7 = sshll.u32 %s422_s19, 7 }
  0xbd   : > { %s1931_s23 = scalar_lea.hbm %s2251_s5, %s1009_s7 }
  0xbe   : > { %s1290_s26 = scalar_lea.hbm %s1931_s23, 256  ;;  %p1296_p12 = scmp.lt.u32.totalorder %s1931_s23, %s2251_s5 }
  0xbf   : > { %p1291_p11 = scmp.ne.s32.totalorder %s1931_s23, %s1290_s26  ;;  %p1297_p10 = scmp.lt.u32.totalorder %s1295_s16, %s1290_s26 }
  0xc0   : > { %p1299_p8 = scmp.lt.u32.totalorder %s1290_s26, %s1931_s23 }
  0xc1   : > { %p1293_p3 = pnand %p1292_p7, %p1291_p11  ;;  %p1298_p6 = por %p1297_p10, %p1296_p12 }
  0xc3   : > { %p1294_p5 = pneg %p1293_p3  ;;  %p1300_p2 = por %p1299_p8, %p1298_p6 }
  0xc5   : > { %p1301_p0 = pnand %p1300_p2, %p1294_p5 }
  0xc7   : > { %1304 = shalt.err (!%p1301_p0)
}
  0xc8   : > { %s1305_s6 = scalar_lea.vmem %s1926_s27, 256  ;;  %s1493_s24 = smov [#allocation11]  }
  0xc9   : > { %p1306_p9 = scmp.ne.s32.totalorder %s1926_s27, %s1305_s6  ;;  %s1310_s19 = sshll.u32 %s1493_s24, 4  ;;  %s1311_s19 = int_to_ptr.vmem [resolvable:$false] %s1310_s19 }
  0xca   : > { %s1312_s7 = scalar_lea.vmem %s1311_s19, 512  ;;  %p1313_p11 = scmp.lt.s32.totalorder %s1926_s27, %s1311_s19 }
  0xcb   : > { %p1308_p1 = pnand %p1306_p9, %p1292_p7  ;;  %p1314_p3 = scmp.lt.s32.totalorder %s1312_s7, %s1305_s6 }
  0xcd   : > { %p1309_p13 = pneg %p1308_p1  ;;  %p1315_p12 = por %p1314_p3, %p1313_p11 }
  0xcf   : > { %p1316_p10 = pnand %p1315_p12, %p1309_p13 }
  0xd1   : > { %1319 = shalt.err (!%p1316_p10)
}
  0xd2   : > { %1064 = dma.hbm_to_vmem [thread:$0]  (!%p2252_p4), %s1931_s23, 256, %s1926_s27, %s1761_s10, %s2246_s29, %s2246_s29, %s2245_s13  }
  0xd3   : > { %p2253_p7 = scmp.ne.s32.totalorder %s2224_s15, 0 }
  0xd4   : > { %s475_s28 = sand.u32 (!%p2253_p7), 1, %s1468_s17   ;;  %p2254_p5 = scmp.ne.s32.totalorder (!%p2253_p7), %s2225_s9, 0 }
  0xd5   : > { %473 = sbr.rel (%p2253_p7) target bundleno = 747 (0x2eb), region = 56  ;;  %s1011_s22 = sshll.u32 (!%p2253_p7), %s475_s28, 4 }
  0xd6   : > { %s476_s26 = scalar_lea.sflag (!%p2253_p7), [#allocation7], %s475_s28  ;;  %s1965_s1 = scalar_lea.vmem (!%p2253_p7), [#allocation6], %s1011_s22 }
  0xdc   : > { %1411 = dma.done.wait (%p2254_p5), %s476_s26, 256  }
  0xdd   : > { %1413 = vsyncadd (%p2254_p5), %s476_s26, 4294967040  ;;  %s484_s11 = sand.u32 1, %s1661_s0   ;;  %s486_s10 = sand.u32 1, %s1456_s14  }
  0xde   : > { %s1012_s13 = sshll.u32 %s486_s10, 4  ;;  %s485_s15 = scalar_lea.sflag [#allocation10], %s484_s11 }
  0xdf   : > { %s1973_s29 = scalar_lea.vmem [#allocation9], %s1012_s13  ;;  %p2255_p4 = scmp.ne.s32.totalorder %s2216_s12, 0 }
  0xe1   : > { %1415 = dma.done.wait (%p2255_p4), %s485_s15, 256  }
  0xe2   : > { %1417 = vsyncadd (%p2255_p4), %s485_s15, 4294967040  ;;  %s2256_s27 = sld [smem:[#allocation38_spill]]  ;;  %s495_s23 = sand.u32 1, %s1444_s30  }
  0xe3   : > { %s1013_s8 = sshll.u32 %s495_s23, 4 }
  0xe4   : > { %s1980_s9 = scalar_lea.vmem [#allocation11], %s1013_s8 }
  0xe8   : > { %p2257_p6 = scmp.ne.s32.totalorder %s2256_s27, 0 }
  0xea   : > { %1419 = dma.done.wait (%p2257_p6), %s485_s15, 256  }
  0xeb   : > { %1421 = vsyncadd (%p2257_p6), %s485_s15, 4294967040  ;;  %s2258_s0 = sld [smem:[#allocation30_spill]]  ;;  %v590_v0 = vlaneseq  ;;  %s2259_s19 = sld [smem:[#allocation42_spill]]  ;;  %vm609_vm1 = vcmask 57344   ;;  %vm627_vm3 = vcmask 516096  }
  0xec   : > { %s2260_s26 = sld [smem:[#allocation43_spill]]  ;;  %s2261_s15 = sld [smem:[#allocation47_spill]] }
  0xed   : > { %v2002_v1 = vand.u32 127, %v590_v0  ;;  %s2262_s5 = sld [smem:[#allocation44_spill]]  ;;  %s2263_s17 = sld [smem:[#allocation45_spill]] }
  0xee   : > { %s2266_s18 = sld [smem:[#allocation46_spill]] }
  0xef   : > { %vm656_vm4 = vcmp.eq.s32.totalorder %v2002_v1, 2  ;;  %vm659_vm5 = vcmp.eq.s32.totalorder %v2002_v1, 3  ;;  %vm663_vm6 = vcmp.eq.s32.totalorder %v2002_v1, 4 }
  0xf1   : > { %p572_p8 = scmp.lt.s32.totalorder %s2258_s0, 1  ;;  %s592_s12 = sld [smem:[#allocation4 + %s2258_s0]] }
  0xf2   : > { %s600_s16 = sld [smem:[#allocation3 + %s2258_s0]] }
  0xf3   : > { %s1990_s4 = scalar_select %p572_p8, %s2258_s0, 1 }
  0xf4   : > { %s601_s25 = sld [smem:[#allocation4 + %s2258_s0]] }
  0xf5   : > { %s574_s7 = scalar_lea.vmem %s2259_s19, %s1990_s4  ;;  %s577_s11 = scalar_lea.vmem %s2260_s26, %s1990_s4 }
  0xf6   : > { %s589_s27 = scalar_lea.vmem %s2261_s15, %s1990_s4  ;;  %s580_s20 = scalar_lea.vmem %s2262_s5, %s1990_s4  ;;  %v604_v3 = vld [vmem:[%s574_s7] sm:$0x1] }
  0xf7   : > { %s583_s6 = scalar_lea.vmem %s2263_s17, %s1990_s4  ;;  %s2016_s24 = sshll.u32 %s592_s12, 5  ;;  %v605_v4 = vld [vmem:[%s577_s11] sm:$0x1] }
  0xf8   : > { %v602_v2 = vstv %s600_s16  ;;  %v606_v6 = vsub.f32 %v604_v3, %v605_v4  ;;  %v638_v7 = vld [vmem:[%s589_s27] sm:$0x1]  ;;  %s2267_s12 = sld [smem:[#allocation25_spill]]  ;;  %p1016_p2 = scmp.lt.s32.totalorder %s2016_s24, 2048 }
  0xf9   : > { %vm2019_vm0 = vcmp.lt.s32.totalorder %v2002_v1, %v602_v2  ;;  %v622_v8 = vld [vmem:[%s580_s20] sm:$0x1]  ;;  %s586_s20 = scalar_lea.vmem %s2266_s18, %s1990_s4  ;;  %v678_v56 = vld [vmem:[%s1965_s1 + $0x8] sm:$0xff] (!%p1016_p2)  ;;  %vm712_vm7 = vcmp.eq.s32.totalorder (!%p1016_p2), %v2002_v1, 0  ;;  %vm715_vm8 = vcmp.eq.s32.totalorder (!%p1016_p2), %v2002_v1, 1 }
  0xfa   : > { %v623_v9 = vld [vmem:[%s583_s6] sm:$0x1]  ;;  %v639_v10 = vsel %vm2019_vm0, %v638_v7, 0.0  ;;  %v620_v11 = vstv %s601_s25  ;;  %v607_v13 = vand.u32 2147483647, %v606_v6  ;;  %v680_v58 = vld [vmem:[%s1973_s29 + $0x8] sm:$0xff] (!%p1016_p2) }
  0xfb   : > { %v624_v12 = vsub.f32 %v622_v8, %v623_v9  ;;  %v640_v14 = vadd.f32 1.0, %v639_v10  ;;  %vm621_vm2 = vcmp.lt.s32.totalorder %v2002_v1, %v620_v11  ;;  %v643_v21 = vld [vmem:[%s586_s20] sm:$0x1]  ;;  %v696_v61 = vld [vmem:[%s1980_s9 + $0x8] sm:$0xff] (!%p1016_p2)  ;;  %v682_v62 = vsub.f32 (!%p1016_p2), %v680_v58, %v678_v56 }
  0xfc   : > { %v608_v16 = vsel %vm2019_vm0, %v607_v13, 0.0  ;;  %v677_v55 = vld [vmem:[%s1965_s1] sm:$0xff] (!%p1016_p2)  ;;  %v698_v2 = vsub.f32 (!%p1016_p2), %v696_v61, %v678_v56 }
  0xfd   : > { %v625_v15 = vand.u32 2147483647, %v624_v12  ;;  %1196 = vlog2.f32 %v640_v14  ;;  %v610_v17 = vsel %vm609_vm1, %v608_v16, 0.0  ;;  %v679_v57 = vld [vmem:[%s1973_s29] sm:$0xff] (!%p1016_p2)  ;;  %v684_v4 = vand.u32 (!%p1016_p2), 2147483647, %v682_v62 }
  0xfe   : > { %611 = vadd.xlane.f32.xlu0 %v610_v17  ;;  %s557_s25 = sand.u32 1, %s2267_s12   ;;  %v681_v59 = vsub.f32 (!%p1016_p2), %v679_v57, %v677_v55  ;;  %v695_v60 = vld [vmem:[%s1980_s9] sm:$0xff] (!%p1016_p2)  ;;  %v700_v6 = vand.u32 (!%p1016_p2), 2147483647, %v698_v2 }
  0xff   : > { %v626_v18 = vsel %vm621_vm2, %v625_v15, 0.0  ;;  %s1014_s19 = sshll.u32 %s557_s25, 3  ;;  %v697_v63 = vsub.f32 (!%p1016_p2), %v695_v60, %v677_v55 }
 0x100   : > { %v628_v19 = vsel %vm627_vm3, %v626_v18, 0.0  ;;  %s2040_s28 = scalar_lea.vmem [#allocation12], %s1014_s19  ;;  %v683_v3 = vand.u32 (!%p1016_p2), 2147483647, %v681_v59 }
 0x101   : > { %v699_v5 = vand.u32 (!%p1016_p2), 2147483647, %v697_v63 }
 0x102   : > { %629 = vadd.xlane.f32.xlu0 %v628_v19  ;;  %v685_v7 = vadd.f32 (!%p1016_p2), %v684_v4, %v683_v3 }
 0x103   : > { %v701_v8 = vadd.f32 (!%p1016_p2), %v700_v6, %v699_v5 }
 0x106   : > { %686 = vadd.xlane.f32.xlu0 (!%p1016_p2), %v685_v7 }
 0x107   : > { %v1197_v20 = vpop.eup %1196 }
 0x108   : > { %v642_v22 = vmul.f32 0.6931472, %v1197_v20 }
 0x10a   : > { %v644_v23 = vsub.f32 %v643_v21, %v642_v22  ;;  %702 = vadd.xlane.f32.xlu0 (!%p1016_p2), %v701_v8 }
 0x10c   : > { %v645_v24 = vand.u32 2147483647, %v644_v23 }
 0x10e   : > { %v646_v25 = vsel %vm609_vm1, %v645_v24, 0.0 }
 0x10f   : > { %647 = vadd.xlane.f32.xlu1 %v646_v25 }
 0x18b   : > { %v612_v26 = vpop.xlane.xlu0 %611 }
 0x18c   : > { %v613_v27 = vrot.slane %v612_v26, 4 }
 0x18e   : > { %v614_v28 = vadd.f32 %v613_v27, %v612_v26 }
 0x18f   : > { %v630_v29 = vpop.xlane.xlu0 %629 }
 0x190   : > { %v615_v30 = vrot.slane %v614_v28, 2  ;;  %v631_v31 = vrot.slane %v630_v29, 4 }
 0x192   : > { %v632_v32 = vadd.f32 %v631_v31, %v630_v29  ;;  %v616_v33 = vadd.f32 %v615_v30, %v614_v28 }
 0x193   : > { %v687_v9 = vpop.xlane.xlu0 (!%p1016_p2), %686 }
 0x194   : > { %v633_v34 = vrot.slane %v632_v32, 2  ;;  %v617_v35 = vrot.slane %v616_v33, 1  ;;  %v688_v10 = vrot.slane (!%p1016_p2), %v687_v9, 4 }
 0x196   : > { %v634_v36 = vadd.f32 %v633_v34, %v632_v32  ;;  %v618_v37 = vadd.f32 %v617_v35, %v616_v33  ;;  %v689_v11 = vadd.f32 (!%p1016_p2), %v688_v10, %v687_v9 }
 0x197   : > { %v703_v12 = vpop.xlane.xlu0 (!%p1016_p2), %702 }
 0x198   : > { %1021 = vpush %v618_v37  ;;  %v635_v38 = vrot.slane %v634_v36, 1  ;;  %v690_v13 = vrot.slane (!%p1016_p2), %v689_v11, 2  ;;  %v704_v14 = vrot.slane (!%p1016_p2), %v703_v12, 4 }
 0x19a   : > { %v636_v39 = vadd.f32 %v635_v38, %v634_v36  ;;  %v705_v15 = vadd.f32 (!%p1016_p2), %v704_v14, %v703_v12  ;;  %v691_v16 = vadd.f32 (!%p1016_p2), %v690_v13, %v689_v11 }
 0x19c   : > { %v648_v40 = vpop.xlane.xlu1 %647  ;;  %1023 = vpush %v636_v39  ;;  %v706_v17 = vrot.slane (!%p1016_p2), %v705_v15, 2  ;;  %v692_v18 = vrot.slane (!%p1016_p2), %v691_v16, 1 }
 0x19d   : > { %v649_v41 = vrot.slane %v648_v40, 4 }
 0x19e   : > { %v707_v19 = vadd.f32 (!%p1016_p2), %v706_v17, %v705_v15  ;;  %v693_v20 = vadd.f32 (!%p1016_p2), %v692_v18, %v691_v16 }
 0x19f   : > { %v650_v42 = vadd.f32 %v649_v41, %v648_v40 }
 0x1a0   : > { %v708_v21 = vrot.slane (!%p1016_p2), %v707_v19, 1 }
 0x1a1   : > { %v651_v43 = vrot.slane %v650_v42, 2 }
 0x1a2   : > { %v709_v22 = vadd.f32 (!%p1016_p2), %v708_v21, %v707_v19 }
 0x1a3   : > { %v652_v44 = vadd.f32 %v651_v43, %v650_v42 }
 0x1a5   : > { %v653_v45 = vrot.slane %v652_v44, 1 }
 0x1a7   : > { %v654_v46 = vadd.f32 %v653_v45, %v652_v44 }
 0x1a9   : > { %1025 = vpush %v654_v46 }
 0x1aa   : > { %1027 = vpush (!%p1016_p2), %v693_v20 }
 0x1ab   : > { %1029 = vpush (!%p1016_p2), %v709_v22 }
 0x1c9   : > { %s1022_s16 = spop %1021 }
 0x1ca   : > { %v657_v47 = vstv %s1022_s16 }
 0x1cb   : > { %v658_v49 = vsel %vm656_vm4, %v657_v47, 0.0 }
 0x1cd   : > { %s1024_s4 = spop %1023 }
 0x1ce   : > { %v660_v48 = vstv %s1024_s4 }
 0x1cf   : > { %v661_v50 = vsel %vm659_vm5, %v660_v48, 0.0 }
 0x1d0   : > { %v662_v51 = vadd.f32 %v661_v50, %v658_v49 }
 0x1d9   : > { %676 = sbr.rel (%p1016_p2) target bundleno = 490 (0x1ea), region = 80 }
 0x1da   : > { %s1026_s7 = spop %1025 }
 0x1db   : > { %v664_v52 = vstv %s1026_s7  ;;  %s1028_s22 = spop (!%p1016_p2), %1027 }
 0x1dc   : > { %v665_v53 = vsel %vm663_vm6, %v664_v52, 0.0  ;;  %v713_v23 = vstv (!%p1016_p2), %s1028_s22  ;;  %s1030_s26 = spop (!%p1016_p2), %1029 }
 0x1dd   : > { %v666_v54 = vadd.f32 %v665_v53, %v662_v51  ;;  %v716_v24 = vstv (!%p1016_p2), %s1030_s26  ;;  %v714_v25 = vsel (!%p1016_p2), %vm712_vm7, %v713_v23, 0.0 }
 0x1de   : > { %v717_v27 = vsel (!%p1016_p2), %vm715_vm8, %v716_v24, 0.0 }
 0x1df   : > { %667 = vst [vmem:[%s2040_s28] sm:$0xff] %v666_v54  ;;  %v718_v28 = vadd.f32 (!%p1016_p2), %v717_v27, %v714_v25 }
 0x1e6   : > { %v711_v26 = vld [vmem:[%s2040_s28] sm:$0xff] }
 0x1e7   : > { %v719_v29 = vadd.f32 %v718_v28, %v711_v26 }
 0x1e9   : > { %720 = vst [vmem:[%s2040_s28] sm:$0xff] %v719_v29 }
 0x1ea PF: > { %p721_p0 = scmp.gt.s32.totalorder %s2016_s24, 0 }
 0x1ec   : > { %p723_p9 = pnand %p1016_p2, %p721_p0 }
 0x1ed   : > { %v727_v30 = vld [vmem:[%s1965_s1] sm:$0xff] (!%p723_p9)  ;;  %v728_v31 = vld [vmem:[%s1965_s1 + $0x8] sm:$0xff] (!%p723_p9)  ;;  %v730_v32 = vshrl.u32 (!%p723_p9), %v590_v0, 7  ;;  %v736_v42 = vstv (!%p723_p9), %s2016_s24  ;;  %vm776_vm11 = vcmp.eq.s32.totalorder (!%p723_p9), %v2002_v1, 0  ;;  %vm779_vm12 = vcmp.eq.s32.totalorder (!%p723_p9), %v2002_v1, 1 }
 0x1ee   : > { %726 = sbr.rel (%p723_p9) target bundleno = 720 (0x2d0), region = 84  ;;  %v739_v33 = vld [vmem:[%s1973_s29] sm:$0xff] (!%p723_p9)  ;;  %v740_v34 = vld [vmem:[%s1973_s29 + $0x8] sm:$0xff] (!%p723_p9) }
 0x1ef   : > { %v741_v35 = vsub.f32 (!%p723_p9), %v739_v33, %v727_v30  ;;  %v757_v36 = vld [vmem:[%s1980_s9] sm:$0xff] (!%p723_p9)  ;;  %v758_v37 = vld [vmem:[%s1980_s9 + $0x8] sm:$0xff] (!%p723_p9)  ;;  %v731_v38 = vadd.s32 (!%p723_p9), 8, %v730_v32  ;;  %v732_v39 = vmul.u32 (!%p723_p9), 128, %v730_v32  ;;  %v742_v40 = vsub.f32 (!%p723_p9), %v740_v34, %v728_v31 }
 0x1f0   : > { %v759_v41 = vsub.f32 (!%p723_p9), %v757_v36, %v727_v30  ;;  %v760_v44 = vsub.f32 (!%p723_p9), %v758_v37, %v728_v31  ;;  %v775_v11 = vld [vmem:[%s2040_s28] sm:$0xff] (!%p723_p9) }
 0x1f1   : > { %v743_v43 = vand.u32 (!%p723_p9), 2147483647, %v741_v35  ;;  %v733_v45 = vmul.u32 (!%p723_p9), 128, %v731_v38  ;;  %v734_v46 = vadd.s32 (!%p723_p9), %v732_v39, %v2002_v1  ;;  %v744_v47 = vand.u32 (!%p723_p9), 2147483647, %v742_v40 }
 0x1f2   : > { %v761_v48 = vand.u32 (!%p723_p9), 2147483647, %v759_v41  ;;  %v762_v49 = vand.u32 (!%p723_p9), 2147483647, %v760_v44 }
 0x1f3   : > { %v735_v0 = vadd.s32 (!%p723_p9), %v733_v45, %v2002_v1  ;;  %vm737_vm9 = vcmp.lt.s32.totalorder (!%p723_p9), %v734_v46, %v736_v42 }
 0x1f4   : > { %v745_v50 = vsel (!%p723_p9), %vm737_vm9, %v743_v43, 0.0  ;;  %v763_v52 = vsel (!%p723_p9), %vm737_vm9, %v761_v48, 0.0 }
 0x1f5   : > { %vm738_vm10 = vcmp.lt.s32.totalorder %v735_v0, %v736_v42 }
 0x1f6   : > { %v746_v51 = vsel %vm738_vm10, %v744_v47, 0.0  ;;  %v764_v53 = vsel %vm738_vm10, %v762_v49, 0.0 }
 0x1f7   : > { %v747_v54 = vadd.f32 %v746_v51, %v745_v50  ;;  %v765_v55 = vadd.f32 %v764_v53, %v763_v52 }
 0x1f9   : > { %748 = vadd.xlane.f32.xlu0 %v747_v54 }
 0x1fd   : > { %766 = vadd.xlane.f32.xlu0 %v765_v55 }
 0x286   : > { %v749_v56 = vpop.xlane.xlu0 %748 }
 0x287   : > { %v750_v57 = vrot.slane %v749_v56, 4 }
 0x289   : > { %v751_v58 = vadd.f32 %v750_v57, %v749_v56 }
 0x28a   : > { %v767_v59 = vpop.xlane.xlu0 %766 }
 0x28b   : > { %v752_v60 = vrot.slane %v751_v58, 2  ;;  %v768_v61 = vrot.slane %v767_v59, 4 }
 0x28d   : > { %v769_v62 = vadd.f32 %v768_v61, %v767_v59  ;;  %v753_v63 = vadd.f32 %v752_v60, %v751_v58 }
 0x28f   : > { %v770_v2 = vrot.slane %v769_v62, 2  ;;  %v754_v3 = vrot.slane %v753_v63, 1 }
 0x291   : > { %v771_v4 = vadd.f32 %v770_v2, %v769_v62  ;;  %v755_v5 = vadd.f32 %v754_v3, %v753_v63 }
 0x293   : > { %1031 = vpush %v755_v5  ;;  %v772_v6 = vrot.slane %v771_v4, 1 }
 0x295   : > { %v773_v7 = vadd.f32 %v772_v6, %v771_v4 }
 0x297   : > { %1033 = vpush %v773_v7 }
 0x2c4   : > { %s1032_s1 = spop %1031 }
 0x2c5   : > { %v777_v8 = vstv %s1032_s1 }
 0x2c6   : > { %v778_v10 = vsel %vm776_vm11, %v777_v8, 0.0 }
 0x2c8   : > { %s1034_s29 = spop %1033 }
 0x2c9   : > { %v780_v9 = vstv %s1034_s29 }
 0x2ca   : > { %v781_v12 = vsel %vm779_vm12, %v780_v9, 0.0 }
 0x2cb   : > { %v782_v13 = vadd.f32 %v781_v12, %v778_v10 }
 0x2cd   : > { %v783_v14 = vadd.f32 %v782_v13, %v775_v11 }
 0x2cf   : > { %784 = vst [vmem:[%s2040_s28] sm:$0xff] %v783_v14 }
 0x2d0 PF: > { %s2268_s9 = sld [smem:[#allocation30_spill]]  ;;  %s2270_s10 = sld [smem:[#allocation34_spill]] }
 0x2d1   : > { %s2271_s23 = sld [smem:[#allocation48_spill]]  ;;  %s800_s0 = sshll.u32 %s2040_s28, 4  ;;  %s801_s0 = int_to_ptr.vmem [resolvable:$true] %s800_s0 }
 0x2d2   : > { %s786_s6 = scalar_lea.sflag [#allocation8], %s557_s25  ;;  %s1320_s24 = scalar_lea.vmem %s801_s0, 128 }
 0x2d3   : > { %p1321_p1 = scmp.ne.s32.totalorder %s801_s0, %s1320_s24  ;;  %s1494_s5 = smov [#allocation12]  }
 0x2d4   : > { %s1324_s17 = sshll.u32 %s1494_s5, 4  ;;  %s1325_s17 = int_to_ptr.vmem [resolvable:$false] %s1324_s17 }
 0x2d5   : > { %s1326_s18 = scalar_lea.vmem %s1325_s17, 256  ;;  %p1327_p12 = scmp.lt.s32.totalorder %s801_s0, %s1325_s17 }
 0x2d6   : > { %s1018_s13 = sshll.u32 %s2268_s9, 7  ;;  %p2272_p13 = scmp.ne.s32.totalorder %s2270_s10, 0 }
 0x2d7   : > { %s2077_s8 = scalar_lea.hbm %s2271_s23, %s1018_s13  ;;  %p1328_p10 = scmp.lt.s32.totalorder %s1326_s18, %s1320_s24 }
 0x2d8   : > { %p1322_p11 = pnand %p1321_p1, %p2272_p13 }
 0x2d9   : > { %p1329_p7 = por %p1328_p10, %p1327_p12 }
 0x2da   : > { %p1323_p3 = pneg %p1322_p11 }
 0x2dc   : > { %p1330_p5 = pnand %p1329_p7, %p1323_p3 }
 0x2de   : > { %1333 = shalt.err (!%p1330_p5)
}
 0x2df   : > { %s1334_s20 = scalar_lea.hbm %s2077_s8, 128  ;;  %s1338_s4 = scalar_lea.hbm %s2271_s23, 256 }
 0x2e0   : > { %p1335_p4 = scmp.ne.s32.totalorder %s2077_s8, %s1334_s20  ;;  %p1339_p2 = scmp.lt.u32.totalorder %s2077_s8, %s2271_s23 }
 0x2e1   : > { %p1340_p0 = scmp.lt.u32.totalorder %s1338_s4, %s1334_s20  ;;  %p1342_p1 = scmp.lt.u32.totalorder %s1334_s20, %s2077_s8 }
 0x2e2   : > { %p1336_p6 = pnand %p1335_p4, %p2272_p13 }
 0x2e3   : > { %p1341_p9 = por %p1340_p0, %p1339_p2 }
 0x2e4   : > { %p1337_p8 = pneg %p1336_p6 }
 0x2e5   : > { %p1343_p11 = por %p1342_p1, %p1341_p9 }
 0x2e7   : > { %p1344_p3 = pnand %p1343_p11, %p1337_p8 }
 0x2e9   : > { %1347 = shalt.err (!%p1344_p3)
}
 0x2ea   : > { %1047 = dma.vmem_to_hbm [thread:$0]  (%p2272_p13), %s801_s0, 128, %s2077_s8, %s786_s6  }
 0x2eb PF: > { %s2273_s7 = sld [smem:[#allocation24_spill]]  ;;  %s2274_s28 = sld [smem:[#allocation35_spill]] }
 0x2ec   : > { %p2276_p10 = scmp.ge.s32.totalorder %s1484_s21, 2 }
 0x2f1   : > { %s812_s22 = sand.u32 1, %s2273_s7   ;;  %p2275_p12 = scmp.ne.s32.totalorder %s2274_s28, 0 }
 0x2f2   : > { %s813_s26 = scalar_lea.sflag [#allocation8], %s812_s22 }
 0x2f3   : > { %p1066_p7 = pnand %p2276_p10, %p2275_p12 }
 0x2f5   : > { %1423 = dma.done.wait (!%p1066_p7), %s813_s26, 128  }
 0x2f6   : > { %1425 = vsyncadd (!%p1066_p7), %s813_s26, 4294967168  ;;  %s41_s21 = sadd.s32 1, %s1484_s21   ;;  %s2278_s26 = sld [smem:[#allocation25_spill]] }
 0x2f7   : > { %p2105_p5 = scmp.ge.s32.totalorder %s41_s21, 4   ;;  %s2279_s27 = sld [smem:[#allocation26_spill]] }
 0x2f8   : > { %s2280_s28 = sld [smem:[#allocation33_spill]]  ;;  %s2281_s9 = sld [smem:[#allocation27_spill]] }
 0x2f9   : > { %s2282_s15 = sld [smem:[#allocation36_spill]]  ;;  %s2283_s16 = sld [smem:[#allocation28_spill]] }
 0x2fa   : > { %s2284_s17 = sld [smem:[#allocation29_spill]]  ;;  %s2285_s18 = sld [smem:[#allocation37_spill]] }
 0x2fb   : > { %s2286_s19 = sld [smem:[#allocation31_spill]]  ;;  %s2287_s20 = sld [smem:[#allocation32_spill]] }
 0x2fc   : > { %s2288_s29 = smov %s1444_s30  ;;  %s2289_s30 = smov %s1448_s2 }
 0x2fd   : > { %s2290_s2 = smov %s1919_s3  ;;  %s2291_s13 = smov %s1456_s14 }
 0x2fe   : > { %s2292_s14 = smov %s2281_s9  ;;  %40 = sbr.rel (!%p2105_p5) target bundleno = 47 (0x2f), region = 159 }
 0x305   :  { %818 = vsyncpa [#allocation7], 1 }
 0x306   :  { %820 = vsyncpa [#allocation7 + $0x1], 1 }
 0x307   :  { %821 = vsyncpa [#allocation10], 1 }
 0x308   :  { %823 = vsyncpa [#allocation10 + $0x1], 1 }
 0x309   :  { %824 = vsyncpa [#allocation8], 1 }
 0x30a   :  { %826 = vsyncpa [#allocation8 + $0x1], 1 }

</bundles_post_ra>
